<compile_context>
chip_gen: v6e
topology: v6e:2x2x1
jax: 0.10.0
libtpu: 0.0.40
codegen_flags: <defaults>
</compile_context>

<pallas_src>
import functools
import math

import jax
import jax.numpy as jnp
from jax.experimental import pallas as pl
from jax.experimental.pallas import tpu as pltpu


# ----------------------------- Fused decoder-layer kernel -----------------------------

def _decoder_layer_kernel(
        x_ref, enc_ref, mself_ref, mcross_ref,
        wqkv1_ref, wo1_ref, wq2_ref, wkv2_ref, wo2_ref, w1_ref, w2_ref,
        bias_ref, ln_ref,
        o_ref, *, B, S, Se, h, dk, dv, d_model, d_ff, eps):
    f32 = jnp.float32
    bf16 = jnp.bfloat16
    Hdk = h * dk
    Hdv = h * dv

    # ---- static offsets into the packed bias slab (lane-dim packed) ----
    # [ bq1|bk1|bv1 | bo1 | bq2 | bk2|bv2 | bo2 | b1 | b2 ]
    off = [0]
    for w in (2 * Hdk + Hdv, d_model, Hdk, Hdk + Hdv, d_model, d_ff, d_model):
        off.append(off[-1] + w)

    def bias(i):
        return bias_ref[:, off[i]:off[i + 1]]          # (1, width) f32

    def ln_row(i):
        return ln_ref[i:i + 1, :]                      # (1, d_model) f32

    def layer_norm(z, gi, bi):                         # z: (B*S, D) f32
        mu = jnp.mean(z, axis=-1, keepdims=True)
        var = jnp.mean((z - mu) ** 2, axis=-1, keepdims=True)
        return (z - mu) * jax.lax.rsqrt(var + eps) * ln_row(gi) + ln_row(bi)

    def split_groups(t, rows, col0, d):
        # t: (B*rows, W) f32 -> (B*h, rows, d) via static row/lane slices
        # + leading-axis concat (no lane-splitting reshape / transpose needed).
        parts = []
        for b in range(B):
            blk = t[b * rows:(b + 1) * rows, :]
            for i in range(h):
                parts.append(blk[:, col0 + i * d: col0 + (i + 1) * d][None])
        return jnp.concatenate(parts, axis=0)

    def merge_groups(ctx):
        # ctx: (B*h, S, dv) f32 -> (B*S, h*dv): one lane-dense slab so the output
        # projection is a single matmul.
        rows = []
        for b in range(B):
            rows.append(jnp.concatenate([ctx[b * h + i] for i in range(h)], axis=-1))
        return jnp.concatenate(rows, axis=0)

    dims_qk = (((2,), (2,)), ((0,), (0,)))   # contract dk, batch over (batch*head)
    dims_pv = (((2,), (1,)), ((0,), (0,)))   # contract keys, batch over (batch*head)

    def mh_attention(q, k, v, neg, wo_ref, bo):
        # q: (G, Sq, dk) f32, k: (G, Sk, dk) f32, v: (G, Sk, dv) f32
        # neg: additive mask broadcastable to (G, Sq, Sk), f32 (-1e9 where blocked)
        s = jax.lax.dot_general(q.astype(bf16), k.astype(bf16), dims_qk,
                                preferred_element_type=f32)          # (G, Sq, Sk)
        s = s + neg
        s = s - jnp.max(s, axis=-1, keepdims=True)
        p = jnp.exp(s)
        # approx reciprocal runs on the EUP slot; use approx=False for bit-level parity.
        p = p * pl.reciprocal(jnp.sum(p, axis=-1, keepdims=True), approx=True)
        ctx = jax.lax.dot_general(p.astype(bf16), v.astype(bf16), dims_pv,
                                  preferred_element_type=f32)        # (G, Sq, dv)
        ctx_flat = merge_groups(ctx).astype(bf16)                    # (B*Sq, h*dv)
        return jnp.dot(ctx_flat, wo_ref[...], preferred_element_type=f32) + bo

    x = x_ref[...].astype(f32)       # (B*S, D)
    enc = enc_ref[...].astype(f32)   # (B*Se, D)

    # In-kernel mask broadcast (tiny VPU work, no HBM traffic).
    neg_self = (mself_ref[...] * (-1e9))[None, :, :]                 # (1, S, S)
    negc = mcross_ref[...] * (-1e9)                                  # (B, Se)
    neg_cross = jnp.concatenate(
        [negc[b:b + 1, :][:, None, :] for b in range(B) for _ in range(h)],
        axis=0)                                                      # (B*h, 1, Se)

    # --- masked self-attention + residual LN (1/sqrt(dk) folded into Wq/bq) ---
    qkv = jnp.dot(x.astype(bf16), wqkv1_ref[...],
                  preferred_element_type=f32) + bias(0)              # (B*S, 2Hdk+Hdv)
    mha1 = mh_attention(split_groups(qkv, S, 0, dk),
                        split_groups(qkv, S, Hdk, dk),
                        split_groups(qkv, S, 2 * Hdk, dv),
                        neg_self, wo1_ref, bias(1))
    x1 = layer_norm(x + mha1, 0, 1)

    # --- cross-attention over encoder output + residual LN ---
    q2 = jnp.dot(x1.astype(bf16), wq2_ref[...],
                 preferred_element_type=f32) + bias(2)               # (B*S, Hdk)
    kv2 = jnp.dot(enc.astype(bf16), wkv2_ref[...],
                  preferred_element_type=f32) + bias(3)              # (B*Se, Hdk+Hdv)
    mha2 = mh_attention(split_groups(q2, S, 0, dk),
                        split_groups(kv2, Se, 0, dk),
                        split_groups(kv2, Se, Hdk, dv),
                        neg_cross, wo2_ref, bias(4))
    x2 = layer_norm(x1 + mha2, 2, 3)

    # --- position-wise feed-forward + residual LN ---
    hid = jnp.maximum(
        jnp.dot(x2.astype(bf16), w1_ref[...], preferred_element_type=f32) + bias(5),
        0.0)                                                         # (B*S, d_ff) f32
    ff = jnp.dot(hid.astype(bf16), w2_ref[...],
                 preferred_element_type=f32) + bias(6)               # (B*S, D) f32
    o_ref[...] = layer_norm(x2 + ff, 4, 5).astype(o_ref.dtype)


# ----------------------------- Wrapper -----------------------------

def _full_spec(shape):
    nd = len(shape)
    return pl.BlockSpec(tuple(shape), lambda *_: (0,) * nd)


def decoder_layer(packed, x, encoder_out, look_ahead_mask, padding_mask,
                  *, h, dk, dv):
    """x: (B, S, D), encoder_out: (B, Se, D); masks float, 1.0 = blocked,
    broadcastable to (B, 1, Sq, Sk); look-ahead mask batch-independent and padding
    mask query-independent (standard decoder usage)."""
    B, S, D = x.shape
    Se = encoder_out.shape[1]
    d_ff = packed["w1"].shape[1]

    # Tiny mask slabs: one (S, S) causal slab + one (B, Se) padding vector.
    m_self = jnp.broadcast_to(jnp.asarray(look_ahead_mask, jnp.float32),
                              (B, 1, S, S))[0, 0]                    # (S, S)
    m_cross = jnp.broadcast_to(jnp.asarray(padding_mask, jnp.float32),
                               (B, 1, 1, Se)).reshape(B, Se)         # (B, Se)

    # Lane-dense 2-D activation slabs (free contiguous reshapes).
    x2d = x.reshape(B * S, D)
    enc2d = encoder_out.reshape(B * Se, D)

    ws = (packed["wqkv1"], packed["wo1"], packed["wq2"], packed["wkv2"],
          packed["wo2"], packed["w1"], packed["w2"], packed["bias"], packed["ln"])

    kernel = functools.partial(_decoder_layer_kernel, B=B, S=S, Se=Se, h=h,
                               dk=dk, dv=dv, d_model=D, d_ff=d_ff, eps=1e-5)
    out = pl.pallas_call(
        kernel,
        out_shape=jax.ShapeDtypeStruct((B * S, D), x.dtype),
        grid=(1,),   # whole batch in one step at these sizes (see TODO above for v7x)
        in_specs=[_full_spec(x2d.shape), _full_spec(enc2d.shape),
                  _full_spec(m_self.shape), _full_spec(m_cross.shape)]
                 + [_full_spec(w.shape) for w in ws],
        out_specs=_full_spec((B * S, D)),
        compiler_params=pltpu.CompilerParams(
            dimension_semantics=("arbitrary",)),
    )(x2d, enc2d, m_self, m_cross, *ws)
    return out.reshape(B, S, D)


# ----------------------------- Param init / packing -----------------------------

def _init_linear(key, fan_in, fan_out):
    kw, kb = jax.random.split(key)
    bound = 1.0 / math.sqrt(fan_in)
    w = jax.random.uniform(kw, (fan_in, fan_out), jnp.float32, -bound, bound)
    b = jax.random.uniform(kb, (1, fan_out), jnp.float32, -bound, bound)
    return w, b


def init_params(key, h, dk, dv, d_model, d_ff):
    """Module-style parameters (same layout/semantics as the PyTorch layer)."""
    k1, k2, k3, k4 = jax.random.split(key, 4)

    def mha_params(k):
        ks = jax.random.split(k, 4)
        wq, bq = _init_linear(ks[0], d_model, h * dk)
        wk, bk = _init_linear(ks[1], d_model, h * dk)
        wv, bv = _init_linear(ks[2], d_model, h * dv)
        wo, bo = _init_linear(ks[3], h * dv, d_model)
        return dict(wq=wq, bq=bq, wk=wk, bk=bk, wv=wv, bv=bv, wo=wo, bo=bo)

    m1, m2 = mha_params(k1), mha_params(k2)
    w1, b1 = _init_linear(k3, d_model, d_ff)
    w2, b2 = _init_linear(k4, d_ff, d_model)
    ones = jnp.ones((1, d_model), jnp.float32)
    zeros = jnp.zeros((1, d_model), jnp.float32)
    return dict(mha1=m1, mha2=m2, w1=w1, b1=b1, w2=w2, b2=b2,
                ln1_g=ones, ln1_b=zeros, ln2_g=ones, ln2_b=zeros,
                ln3_g=ones, ln3_b=zeros)


def pack_params(p, h, dk, dv):
    """One-time, call-site preparation (free, not per-call work):
       * fold 1/sqrt(dk) into the Q projection weights AND biases,
       * fuse QKV / KV projections into lane-dense slabs,
       * pack biases and LayerNorm params into single slabs (fewer DMAs),
       * cast the matmul weight matrices to bf16 (MXU-native operands)."""
    bf16 = jnp.bfloat16
    scale = 1.0 / math.sqrt(dk)
    m1, m2 = p["mha1"], p["mha2"]
    wq1, bq1 = m1["wq"] * scale, m1["bq"] * scale
    wq2, bq2 = m2["wq"] * scale, m2["bq"] * scale

    bias = jnp.concatenate(
        [bq1, m1["bk"], m1["bv"], m1["bo"],
         bq2, m2["bk"], m2["bv"], m2["bo"],
         p["b1"], p["b2"]], axis=1)                                   # (1, total) f32
    ln = jnp.concatenate([p["ln1_g"], p["ln1_b"], p["ln2_g"], p["ln2_b"],
                          p["ln3_g"], p["ln3_b"]], axis=0)            # (6, D) f32
    return dict(
        wqkv1=jnp.concatenate([wq1, m1["wk"], m1["wv"]], axis=1).astype(bf16),
        wo1=m1["wo"].astype(bf16),
        wq2=wq2.astype(bf16),
        wkv2=jnp.concatenate([m2["wk"], m2["wv"]], axis=1).astype(bf16),
        wo2=m2["wo"].astype(bf16),
        w1=p["w1"].astype(bf16), w2=p["w2"].astype(bf16),
        bias=bias, ln=ln)


# ----------------------------- Main -----------------------------

if __name__ == "__main__":
    # DecoderLayer(h=4, dk=8, dv=8, d_model=32, d_ff=64, rate=0.1), training=False
    h, dk, dv, d_model, d_ff = 4, 8, 8, 32, 64
    B, S_dec, S_enc = 2, 8, 8

    key = jax.random.PRNGKey(0)
    k_p, k_x, k_e = jax.random.split(key, 3)
    params = init_params(k_p, h, dk, dv, d_model, d_ff)
    packed = pack_params(params, h, dk, dv)

    x = jax.random.normal(k_x, (B, S_dec, d_model), jnp.float32)
    encoder_out = jax.random.normal(k_e, (B, S_enc, d_model), jnp.float32)

    # look-ahead mask: 1.0 above the diagonal (future positions blocked)
    look_ahead_mask = (1.0 - jnp.tril(jnp.ones((S_dec, S_dec), jnp.float32)))
    look_ahead_mask = look_ahead_mask[None, None, :, :]          # (1,1,Sq,Sq)
    # padding mask: block last 2 encoder positions of batch element 1
    pad = jnp.zeros((B, S_enc), jnp.float32).at[1, -2:].set(1.0)
    padding_mask = pad[:, None, None, :]                         # (B,1,1,Sk)

    fwd = jax.jit(functools.partial(decoder_layer, h=h, dk=dk, dv=dv))
    out = fwd(packed, x, encoder_out, look_ahead_mask, padding_mask)
    out = jax.block_until_ready(out)
    assert out.shape == (B, S_dec, d_model)
    assert bool(jnp.all(jnp.isfinite(out)))
    print("KERNEL_OK")
</pallas_src>

<mosaic_0001>
module attributes {stable_mosaic.version = 11 : i64} {
  func.func @_decoder_layer_kernel(%arg0: i32, %arg1: memref<16x32xf32, #tpu.memory_space<vmem>>, %arg2: memref<16x32xf32, #tpu.memory_space<vmem>>, %arg3: memref<8x8xf32, #tpu.memory_space<vmem>>, %arg4: memref<2x8xf32, #tpu.memory_space<vmem>>, %arg5: memref<32x96xbf16, #tpu.memory_space<vmem>>, %arg6: memref<32x32xbf16, #tpu.memory_space<vmem>>, %arg7: memref<32x32xbf16, #tpu.memory_space<vmem>>, %arg8: memref<32x64xbf16, #tpu.memory_space<vmem>>, %arg9: memref<32x32xbf16, #tpu.memory_space<vmem>>, %arg10: memref<32x64xbf16, #tpu.memory_space<vmem>>, %arg11: memref<64x32xbf16, #tpu.memory_space<vmem>>, %arg12: memref<1x352xf32, #tpu.memory_space<vmem>>, %arg13: memref<6x32xf32, #tpu.memory_space<vmem>>, %arg14: memref<16x32xf32, #tpu.memory_space<vmem>>) attributes {dimension_semantics = [#tpu.dimension_semantics<arbitrary>], iteration_bounds = array<i64: 1>, scalar_prefetch = 0 : i64, scratch_operands = 0 : i64, tpu.core_type = #tpu.core_type<tc>, window_params = [{pipeline_mode = #tpu.pipeline_mode<synchronous>, transform_indices = @transform_0, window_bounds = array<i64: 16, 32>}, {pipeline_mode = #tpu.pipeline_mode<synchronous>, transform_indices = @transform_1, window_bounds = array<i64: 16, 32>}, {pipeline_mode = #tpu.pipeline_mode<synchronous>, transform_indices = @transform_2, window_bounds = array<i64: 8, 8>}, {pipeline_mode = #tpu.pipeline_mode<synchronous>, transform_indices = @transform_3, window_bounds = array<i64: 2, 8>}, {pipeline_mode = #tpu.pipeline_mode<synchronous>, transform_indices = @transform_4, window_bounds = array<i64: 32, 96>}, {pipeline_mode = #tpu.pipeline_mode<synchronous>, transform_indices = @transform_5, window_bounds = array<i64: 32, 32>}, {pipeline_mode = #tpu.pipeline_mode<synchronous>, transform_indices = @transform_6, window_bounds = array<i64: 32, 32>}, {pipeline_mode = #tpu.pipeline_mode<synchronous>, transform_indices = @transform_7, window_bounds = array<i64: 32, 64>}, {pipeline_mode = #tpu.pipeline_mode<synchronous>, transform_indices = @transform_8, window_bounds = array<i64: 32, 32>}, {pipeline_mode = #tpu.pipeline_mode<synchronous>, transform_indices = @transform_9, window_bounds = array<i64: 32, 64>}, {pipeline_mode = #tpu.pipeline_mode<synchronous>, transform_indices = @transform_10, window_bounds = array<i64: 64, 32>}, {pipeline_mode = #tpu.pipeline_mode<synchronous>, transform_indices = @transform_11, window_bounds = array<i64: 1, 352>}, {pipeline_mode = #tpu.pipeline_mode<synchronous>, transform_indices = @transform_12, window_bounds = array<i64: 6, 32>}, {pipeline_mode = #tpu.pipeline_mode<synchronous>, transform_indices = @transform_13, window_bounds = array<i64: 16, 32>}]} {
    %c0 = arith.constant 0 : index
    %c0_0 = arith.constant 0 : index
    %0 = vector.load %arg1[%c0, %c0_0] : memref<16x32xf32, #tpu.memory_space<vmem>>, vector<16x32xf32>
    %c0_1 = arith.constant 0 : index
    %c0_2 = arith.constant 0 : index
    %1 = vector.load %arg2[%c0_1, %c0_2] : memref<16x32xf32, #tpu.memory_space<vmem>>, vector<16x32xf32>
    %c0_3 = arith.constant 0 : index
    %c0_4 = arith.constant 0 : index
    %2 = vector.load %arg3[%c0_3, %c0_4] : memref<8x8xf32, #tpu.memory_space<vmem>>, vector<8x8xf32>
    %cst = arith.constant -1.000000e+09 : f32
    %3 = vector.broadcast %cst : f32 to vector<8x8xf32>
    %4 = arith.mulf %2, %3 : vector<8x8xf32>
    %5 = vector.shape_cast %4 : vector<8x8xf32> to vector<1x8x8xf32>
    %c0_5 = arith.constant 0 : index
    %c0_6 = arith.constant 0 : index
    %6 = vector.load %arg4[%c0_5, %c0_6] : memref<2x8xf32, #tpu.memory_space<vmem>>, vector<2x8xf32>
    %cst_7 = arith.constant -1.000000e+09 : f32
    %7 = vector.broadcast %cst_7 : f32 to vector<2x8xf32>
    %8 = arith.mulf %6, %7 : vector<2x8xf32>
    %9 = vector.extract_strided_slice %8 {offsets = [0, 0], sizes = [1, 8], strides = [1, 1]} : vector<2x8xf32> to vector<1x8xf32>
    %10 = vector.shape_cast %9 : vector<1x8xf32> to vector<1x1x8xf32>
    %11 = vector.extract_strided_slice %8 {offsets = [0, 0], sizes = [1, 8], strides = [1, 1]} : vector<2x8xf32> to vector<1x8xf32>
    %12 = vector.shape_cast %11 : vector<1x8xf32> to vector<1x1x8xf32>
    %13 = vector.extract_strided_slice %8 {offsets = [0, 0], sizes = [1, 8], strides = [1, 1]} : vector<2x8xf32> to vector<1x8xf32>
    %14 = vector.shape_cast %13 : vector<1x8xf32> to vector<1x1x8xf32>
    %15 = vector.extract_strided_slice %8 {offsets = [0, 0], sizes = [1, 8], strides = [1, 1]} : vector<2x8xf32> to vector<1x8xf32>
    %16 = vector.shape_cast %15 : vector<1x8xf32> to vector<1x1x8xf32>
    %17 = vector.extract_strided_slice %8 {offsets = [1, 0], sizes = [1, 8], strides = [1, 1]} : vector<2x8xf32> to vector<1x8xf32>
    %18 = vector.shape_cast %17 : vector<1x8xf32> to vector<1x1x8xf32>
    %19 = vector.extract_strided_slice %8 {offsets = [1, 0], sizes = [1, 8], strides = [1, 1]} : vector<2x8xf32> to vector<1x8xf32>
    %20 = vector.shape_cast %19 : vector<1x8xf32> to vector<1x1x8xf32>
    %21 = vector.extract_strided_slice %8 {offsets = [1, 0], sizes = [1, 8], strides = [1, 1]} : vector<2x8xf32> to vector<1x8xf32>
    %22 = vector.shape_cast %21 : vector<1x8xf32> to vector<1x1x8xf32>
    %23 = vector.extract_strided_slice %8 {offsets = [1, 0], sizes = [1, 8], strides = [1, 1]} : vector<2x8xf32> to vector<1x8xf32>
    %24 = vector.shape_cast %23 : vector<1x8xf32> to vector<1x1x8xf32>
    %25 = tpu.concatenate %10, %12, %14, %16, %18, %20, %22, %24 in 0 : vector<1x1x8xf32>, vector<1x1x8xf32>, vector<1x1x8xf32>, vector<1x1x8xf32>, vector<1x1x8xf32>, vector<1x1x8xf32>, vector<1x1x8xf32>, vector<1x1x8xf32> -> vector<8x1x8xf32>
    %26 = arith.truncf %0 : vector<16x32xf32> to vector<16x32xbf16>
    %c0_8 = arith.constant 0 : index
    %c0_9 = arith.constant 0 : index
    %27 = vector.load %arg5[%c0_8, %c0_9] : memref<32x96xbf16, #tpu.memory_space<vmem>>, vector<32x96xbf16>
    %cst_10 = arith.constant dense<0.000000e+00> : vector<16x96xf32>
    %28 = tpu.matmul %26, %27, %cst_10 {dimension_numbers = #tpu.dot_dimension_numbers<[1], [0], [0], [1], [0, 0, 1, 1], [], []>} : vector<16x32xbf16>, vector<32x96xbf16>, vector<16x96xf32> -> vector<16x96xf32>
    %c0_11 = arith.constant 0 : index
    %c0_12 = arith.constant 0 : index
    %29 = vector.load %arg12[%c0_11, %c0_12] : memref<1x352xf32, #tpu.memory_space<vmem>>, vector<1x96xf32>
    %30 = vector.broadcast %29 : vector<1x96xf32> to vector<16x96xf32>
    %31 = arith.addf %28, %30 : vector<16x96xf32>
    %32 = vector.extract_strided_slice %31 {offsets = [0, 0], sizes = [8, 96], strides = [1, 1]} : vector<16x96xf32> to vector<8x96xf32>
    %33 = vector.extract_strided_slice %32 {offsets = [0, 0], sizes = [8, 8], strides = [1, 1]} : vector<8x96xf32> to vector<8x8xf32>
    %34 = vector.shape_cast %33 : vector<8x8xf32> to vector<1x8x8xf32>
    %35 = vector.extract_strided_slice %32 {offsets = [0, 8], sizes = [8, 8], strides = [1, 1]} : vector<8x96xf32> to vector<8x8xf32>
    %36 = vector.shape_cast %35 : vector<8x8xf32> to vector<1x8x8xf32>
    %37 = vector.extract_strided_slice %32 {offsets = [0, 16], sizes = [8, 8], strides = [1, 1]} : vector<8x96xf32> to vector<8x8xf32>
    %38 = vector.shape_cast %37 : vector<8x8xf32> to vector<1x8x8xf32>
    %39 = vector.extract_strided_slice %32 {offsets = [0, 24], sizes = [8, 8], strides = [1, 1]} : vector<8x96xf32> to vector<8x8xf32>
    %40 = vector.shape_cast %39 : vector<8x8xf32> to vector<1x8x8xf32>
    %41 = vector.extract_strided_slice %31 {offsets = [8, 0], sizes = [8, 96], strides = [1, 1]} : vector<16x96xf32> to vector<8x96xf32>
    %42 = vector.extract_strided_slice %41 {offsets = [0, 0], sizes = [8, 8], strides = [1, 1]} : vector<8x96xf32> to vector<8x8xf32>
    %43 = vector.shape_cast %42 : vector<8x8xf32> to vector<1x8x8xf32>
    %44 = vector.extract_strided_slice %41 {offsets = [0, 8], sizes = [8, 8], strides = [1, 1]} : vector<8x96xf32> to vector<8x8xf32>
    %45 = vector.shape_cast %44 : vector<8x8xf32> to vector<1x8x8xf32>
    %46 = vector.extract_strided_slice %41 {offsets = [0, 16], sizes = [8, 8], strides = [1, 1]} : vector<8x96xf32> to vector<8x8xf32>
    %47 = vector.shape_cast %46 : vector<8x8xf32> to vector<1x8x8xf32>
    %48 = vector.extract_strided_slice %41 {offsets = [0, 24], sizes = [8, 8], strides = [1, 1]} : vector<8x96xf32> to vector<8x8xf32>
    %49 = vector.shape_cast %48 : vector<8x8xf32> to vector<1x8x8xf32>
    %50 = tpu.concatenate %34, %36, %38, %40, %43, %45, %47, %49 in 0 : vector<1x8x8xf32>, vector<1x8x8xf32>, vector<1x8x8xf32>, vector<1x8x8xf32>, vector<1x8x8xf32>, vector<1x8x8xf32>, vector<1x8x8xf32>, vector<1x8x8xf32> -> vector<8x8x8xf32>
    %51 = vector.extract_strided_slice %31 {offsets = [0, 0], sizes = [8, 96], strides = [1, 1]} : vector<16x96xf32> to vector<8x96xf32>
    %52 = vector.extract_strided_slice %51 {offsets = [0, 32], sizes = [8, 8], strides = [1, 1]} : vector<8x96xf32> to vector<8x8xf32>
    %53 = vector.shape_cast %52 : vector<8x8xf32> to vector<1x8x8xf32>
    %54 = vector.extract_strided_slice %51 {offsets = [0, 40], sizes = [8, 8], strides = [1, 1]} : vector<8x96xf32> to vector<8x8xf32>
    %55 = vector.shape_cast %54 : vector<8x8xf32> to vector<1x8x8xf32>
    %56 = vector.extract_strided_slice %51 {offsets = [0, 48], sizes = [8, 8], strides = [1, 1]} : vector<8x96xf32> to vector<8x8xf32>
    %57 = vector.shape_cast %56 : vector<8x8xf32> to vector<1x8x8xf32>
    %58 = vector.extract_strided_slice %51 {offsets = [0, 56], sizes = [8, 8], strides = [1, 1]} : vector<8x96xf32> to vector<8x8xf32>
    %59 = vector.shape_cast %58 : vector<8x8xf32> to vector<1x8x8xf32>
    %60 = vector.extract_strided_slice %31 {offsets = [8, 0], sizes = [8, 96], strides = [1, 1]} : vector<16x96xf32> to vector<8x96xf32>
    %61 = vector.extract_strided_slice %60 {offsets = [0, 32], sizes = [8, 8], strides = [1, 1]} : vector<8x96xf32> to vector<8x8xf32>
    %62 = vector.shape_cast %61 : vector<8x8xf32> to vector<1x8x8xf32>
    %63 = vector.extract_strided_slice %60 {offsets = [0, 40], sizes = [8, 8], strides = [1, 1]} : vector<8x96xf32> to vector<8x8xf32>
    %64 = vector.shape_cast %63 : vector<8x8xf32> to vector<1x8x8xf32>
    %65 = vector.extract_strided_slice %60 {offsets = [0, 48], sizes = [8, 8], strides = [1, 1]} : vector<8x96xf32> to vector<8x8xf32>
    %66 = vector.shape_cast %65 : vector<8x8xf32> to vector<1x8x8xf32>
    %67 = vector.extract_strided_slice %60 {offsets = [0, 56], sizes = [8, 8], strides = [1, 1]} : vector<8x96xf32> to vector<8x8xf32>
    %68 = vector.shape_cast %67 : vector<8x8xf32> to vector<1x8x8xf32>
    %69 = tpu.concatenate %53, %55, %57, %59, %62, %64, %66, %68 in 0 : vector<1x8x8xf32>, vector<1x8x8xf32>, vector<1x8x8xf32>, vector<1x8x8xf32>, vector<1x8x8xf32>, vector<1x8x8xf32>, vector<1x8x8xf32>, vector<1x8x8xf32> -> vector<8x8x8xf32>
    %70 = vector.extract_strided_slice %31 {offsets = [0, 0], sizes = [8, 96], strides = [1, 1]} : vector<16x96xf32> to vector<8x96xf32>
    %71 = vector.extract_strided_slice %70 {offsets = [0, 64], sizes = [8, 8], strides = [1, 1]} : vector<8x96xf32> to vector<8x8xf32>
    %72 = vector.shape_cast %71 : vector<8x8xf32> to vector<1x8x8xf32>
    %73 = vector.extract_strided_slice %70 {offsets = [0, 72], sizes = [8, 8], strides = [1, 1]} : vector<8x96xf32> to vector<8x8xf32>
    %74 = vector.shape_cast %73 : vector<8x8xf32> to vector<1x8x8xf32>
    %75 = vector.extract_strided_slice %70 {offsets = [0, 80], sizes = [8, 8], strides = [1, 1]} : vector<8x96xf32> to vector<8x8xf32>
    %76 = vector.shape_cast %75 : vector<8x8xf32> to vector<1x8x8xf32>
    %77 = vector.extract_strided_slice %70 {offsets = [0, 88], sizes = [8, 8], strides = [1, 1]} : vector<8x96xf32> to vector<8x8xf32>
    %78 = vector.shape_cast %77 : vector<8x8xf32> to vector<1x8x8xf32>
    %79 = vector.extract_strided_slice %31 {offsets = [8, 0], sizes = [8, 96], strides = [1, 1]} : vector<16x96xf32> to vector<8x96xf32>
    %80 = vector.extract_strided_slice %79 {offsets = [0, 64], sizes = [8, 8], strides = [1, 1]} : vector<8x96xf32> to vector<8x8xf32>
    %81 = vector.shape_cast %80 : vector<8x8xf32> to vector<1x8x8xf32>
    %82 = vector.extract_strided_slice %79 {offsets = [0, 72], sizes = [8, 8], strides = [1, 1]} : vector<8x96xf32> to vector<8x8xf32>
    %83 = vector.shape_cast %82 : vector<8x8xf32> to vector<1x8x8xf32>
    %84 = vector.extract_strided_slice %79 {offsets = [0, 80], sizes = [8, 8], strides = [1, 1]} : vector<8x96xf32> to vector<8x8xf32>
    %85 = vector.shape_cast %84 : vector<8x8xf32> to vector<1x8x8xf32>
    %86 = vector.extract_strided_slice %79 {offsets = [0, 88], sizes = [8, 8], strides = [1, 1]} : vector<8x96xf32> to vector<8x8xf32>
    %87 = vector.shape_cast %86 : vector<8x8xf32> to vector<1x8x8xf32>
    %88 = tpu.concatenate %72, %74, %76, %78, %81, %83, %85, %87 in 0 : vector<1x8x8xf32>, vector<1x8x8xf32>, vector<1x8x8xf32>, vector<1x8x8xf32>, vector<1x8x8xf32>, vector<1x8x8xf32>, vector<1x8x8xf32>, vector<1x8x8xf32> -> vector<8x8x8xf32>
    %c0_13 = arith.constant 0 : index
    %c96 = arith.constant 96 : index
    %89 = vector.load %arg12[%c0_13, %c96] : memref<1x352xf32, #tpu.memory_space<vmem>>, vector<1x32xf32>
    %90 = arith.truncf %50 : vector<8x8x8xf32> to vector<8x8x8xbf16>
    %91 = arith.truncf %69 : vector<8x8x8xf32> to vector<8x8x8xbf16>
    %cst_14 = arith.constant dense<0.000000e+00> : vector<8x8x8xf32>
    %92 = tpu.matmul %90, %91, %cst_14 {dimension_numbers = #tpu.dot_dimension_numbers<[2], [2], [1], [1], [0, 0, 0, 1, 1, 1], [0], [0]>} : vector<8x8x8xbf16>, vector<8x8x8xbf16>, vector<8x8x8xf32> -> vector<8x8x8xf32>
    %93 = vector.broadcast %5 : vector<1x8x8xf32> to vector<8x8x8xf32>
    %94 = arith.addf %92, %93 : vector<8x8x8xf32>
    %cst_15 = arith.constant dense<0xFF800000> : vector<8x8xf32>
    %95 = vector.multi_reduction <maximumf>, %94, %cst_15 [2] : vector<8x8x8xf32> to vector<8x8xf32>
    %96 = vector.shape_cast %95 : vector<8x8xf32> to vector<8x8x1xf32>
    %97 = vector.broadcast %96 : vector<8x8x1xf32> to vector<8x8x8xf32>
    %98 = arith.subf %94, %97 : vector<8x8x8xf32>
    %99 = math.exp %98 : vector<8x8x8xf32>
    %cst_16 = arith.constant dense<0.000000e+00> : vector<8x8xf32>
    %100 = vector.multi_reduction <add>, %99, %cst_16 [2] : vector<8x8x8xf32> to vector<8x8xf32>
    %101 = vector.shape_cast %100 : vector<8x8xf32> to vector<8x8x1xf32>
    %102 = tpu.reciprocal %101 {approx = true} : vector<8x8x1xf32> -> vector<8x8x1xf32>
    %103 = vector.broadcast %102 : vector<8x8x1xf32> to vector<8x8x8xf32>
    %104 = arith.mulf %99, %103 : vector<8x8x8xf32>
    %105 = arith.truncf %104 : vector<8x8x8xf32> to vector<8x8x8xbf16>
    %106 = arith.truncf %88 : vector<8x8x8xf32> to vector<8x8x8xbf16>
    %cst_17 = arith.constant dense<0.000000e+00> : vector<8x8x8xf32>
    %107 = tpu.matmul %105, %106, %cst_17 {dimension_numbers = #tpu.dot_dimension_numbers<[2], [1], [1], [2], [0, 0, 0, 1, 1, 2], [0], [0]>} : vector<8x8x8xbf16>, vector<8x8x8xbf16>, vector<8x8x8xf32> -> vector<8x8x8xf32>
    %108 = vector.extract_strided_slice %107 {offsets = [0, 0, 0], sizes = [1, 8, 8], strides = [1, 1, 1]} : vector<8x8x8xf32> to vector<1x8x8xf32>
    %109 = vector.shape_cast %108 : vector<1x8x8xf32> to vector<8x8xf32>
    %110 = vector.extract_strided_slice %107 {offsets = [1, 0, 0], sizes = [1, 8, 8], strides = [1, 1, 1]} : vector<8x8x8xf32> to vector<1x8x8xf32>
    %111 = vector.shape_cast %110 : vector<1x8x8xf32> to vector<8x8xf32>
    %112 = vector.extract_strided_slice %107 {offsets = [2, 0, 0], sizes = [1, 8, 8], strides = [1, 1, 1]} : vector<8x8x8xf32> to vector<1x8x8xf32>
    %113 = vector.shape_cast %112 : vector<1x8x8xf32> to vector<8x8xf32>
    %114 = vector.extract_strided_slice %107 {offsets = [3, 0, 0], sizes = [1, 8, 8], strides = [1, 1, 1]} : vector<8x8x8xf32> to vector<1x8x8xf32>
    %115 = vector.shape_cast %114 : vector<1x8x8xf32> to vector<8x8xf32>
    %116 = tpu.concatenate %109, %111, %113, %115 in 1 : vector<8x8xf32>, vector<8x8xf32>, vector<8x8xf32>, vector<8x8xf32> -> vector<8x32xf32>
    %117 = vector.extract_strided_slice %107 {offsets = [4, 0, 0], sizes = [1, 8, 8], strides = [1, 1, 1]} : vector<8x8x8xf32> to vector<1x8x8xf32>
    %118 = vector.shape_cast %117 : vector<1x8x8xf32> to vector<8x8xf32>
    %119 = vector.extract_strided_slice %107 {offsets = [5, 0, 0], sizes = [1, 8, 8], strides = [1, 1, 1]} : vector<8x8x8xf32> to vector<1x8x8xf32>
    %120 = vector.shape_cast %119 : vector<1x8x8xf32> to vector<8x8xf32>
    %121 = vector.extract_strided_slice %107 {offsets = [6, 0, 0], sizes = [1, 8, 8], strides = [1, 1, 1]} : vector<8x8x8xf32> to vector<1x8x8xf32>
    %122 = vector.shape_cast %121 : vector<1x8x8xf32> to vector<8x8xf32>
    %123 = vector.extract_strided_slice %107 {offsets = [7, 0, 0], sizes = [1, 8, 8], strides = [1, 1, 1]} : vector<8x8x8xf32> to vector<1x8x8xf32>
    %124 = vector.shape_cast %123 : vector<1x8x8xf32> to vector<8x8xf32>
    %125 = tpu.concatenate %118, %120, %122, %124 in 1 : vector<8x8xf32>, vector<8x8xf32>, vector<8x8xf32>, vector<8x8xf32> -> vector<8x32xf32>
    %126 = tpu.concatenate %116, %125 in 0 : vector<8x32xf32>, vector<8x32xf32> -> vector<16x32xf32>
    %127 = arith.truncf %126 : vector<16x32xf32> to vector<16x32xbf16>
    %c0_18 = arith.constant 0 : index
    %c0_19 = arith.constant 0 : index
    %128 = vector.load %arg6[%c0_18, %c0_19] : memref<32x32xbf16, #tpu.memory_space<vmem>>, vector<32x32xbf16>
    %cst_20 = arith.constant dense<0.000000e+00> : vector<16x32xf32>
    %129 = tpu.matmul %127, %128, %cst_20 {dimension_numbers = #tpu.dot_dimension_numbers<[1], [0], [0], [1], [0, 0, 1, 1], [], []>} : vector<16x32xbf16>, vector<32x32xbf16>, vector<16x32xf32> -> vector<16x32xf32>
    %130 = vector.broadcast %89 : vector<1x32xf32> to vector<16x32xf32>
    %131 = arith.addf %129, %130 : vector<16x32xf32>
    %132 = arith.addf %0, %131 : vector<16x32xf32>
    %cst_21 = arith.constant dense<0.000000e+00> : vector<16xf32>
    %133 = vector.multi_reduction <add>, %132, %cst_21 [1] : vector<16x32xf32> to vector<16xf32>
    %134 = vector.shape_cast %133 : vector<16xf32> to vector<16x1xf32>
    %cst_22 = arith.constant 3.200000e+01 : f32
    %135 = vector.broadcast %cst_22 : f32 to vector<16x1xf32>
    %136 = arith.divf %134, %135 : vector<16x1xf32>
    %137 = vector.broadcast %136 : vector<16x1xf32> to vector<16x32xf32>
    %138 = arith.subf %132, %137 : vector<16x32xf32>
    %139 = arith.mulf %138, %138 : vector<16x32xf32>
    %cst_23 = arith.constant dense<0.000000e+00> : vector<16xf32>
    %140 = vector.multi_reduction <add>, %139, %cst_23 [1] : vector<16x32xf32> to vector<16xf32>
    %141 = vector.shape_cast %140 : vector<16xf32> to vector<16x1xf32>
    %cst_24 = arith.constant 3.200000e+01 : f32
    %142 = vector.broadcast %cst_24 : f32 to vector<16x1xf32>
    %143 = arith.divf %141, %142 : vector<16x1xf32>
    %144 = vector.broadcast %136 : vector<16x1xf32> to vector<16x32xf32>
    %145 = arith.subf %132, %144 : vector<16x32xf32>
    %cst_25 = arith.constant 9.99999974E-6 : f32
    %146 = vector.broadcast %cst_25 : f32 to vector<16x1xf32>
    %147 = arith.addf %143, %146 : vector<16x1xf32>
    %148 = math.rsqrt %147 : vector<16x1xf32>
    %149 = vector.broadcast %148 : vector<16x1xf32> to vector<16x32xf32>
    %150 = arith.mulf %145, %149 : vector<16x32xf32>
    %c0_26 = arith.constant 0 : index
    %c0_27 = arith.constant 0 : index
    %151 = vector.load %arg13[%c0_26, %c0_27] : memref<6x32xf32, #tpu.memory_space<vmem>>, vector<1x32xf32>
    %152 = vector.broadcast %151 : vector<1x32xf32> to vector<16x32xf32>
    %153 = arith.mulf %150, %152 : vector<16x32xf32>
    %c1 = arith.constant 1 : index
    %c0_28 = arith.constant 0 : index
    %154 = vector.load %arg13[%c1, %c0_28] : memref<6x32xf32, #tpu.memory_space<vmem>>, vector<1x32xf32>
    %155 = vector.broadcast %154 : vector<1x32xf32> to vector<16x32xf32>
    %156 = arith.addf %153, %155 : vector<16x32xf32>
    %157 = arith.truncf %156 : vector<16x32xf32> to vector<16x32xbf16>
    %c0_29 = arith.constant 0 : index
    %c0_30 = arith.constant 0 : index
    %158 = vector.load %arg7[%c0_29, %c0_30] : memref<32x32xbf16, #tpu.memory_space<vmem>>, vector<32x32xbf16>
    %cst_31 = arith.constant dense<0.000000e+00> : vector<16x32xf32>
    %159 = tpu.matmul %157, %158, %cst_31 {dimension_numbers = #tpu.dot_dimension_numbers<[1], [0], [0], [1], [0, 0, 1, 1], [], []>} : vector<16x32xbf16>, vector<32x32xbf16>, vector<16x32xf32> -> vector<16x32xf32>
    %c0_32 = arith.constant 0 : index
    %c128 = arith.constant 128 : index
    %160 = vector.load %arg12[%c0_32, %c128] : memref<1x352xf32, #tpu.memory_space<vmem>>, vector<1x32xf32>
    %161 = vector.broadcast %160 : vector<1x32xf32> to vector<16x32xf32>
    %162 = arith.addf %159, %161 : vector<16x32xf32>
    %163 = arith.truncf %1 : vector<16x32xf32> to vector<16x32xbf16>
    %c0_33 = arith.constant 0 : index
    %c0_34 = arith.constant 0 : index
    %164 = vector.load %arg8[%c0_33, %c0_34] : memref<32x64xbf16, #tpu.memory_space<vmem>>, vector<32x64xbf16>
    %cst_35 = arith.constant dense<0.000000e+00> : vector<16x64xf32>
    %165 = tpu.matmul %163, %164, %cst_35 {dimension_numbers = #tpu.dot_dimension_numbers<[1], [0], [0], [1], [0, 0, 1, 1], [], []>} : vector<16x32xbf16>, vector<32x64xbf16>, vector<16x64xf32> -> vector<16x64xf32>
    %c0_36 = arith.constant 0 : index
    %c160 = arith.constant 160 : index
    %166 = vector.load %arg12[%c0_36, %c160] : memref<1x352xf32, #tpu.memory_space<vmem>>, vector<1x64xf32>
    %167 = vector.broadcast %166 : vector<1x64xf32> to vector<16x64xf32>
    %168 = arith.addf %165, %167 : vector<16x64xf32>
    %169 = vector.extract_strided_slice %162 {offsets = [0, 0], sizes = [8, 32], strides = [1, 1]} : vector<16x32xf32> to vector<8x32xf32>
    %170 = vector.extract_strided_slice %169 {offsets = [0, 0], sizes = [8, 8], strides = [1, 1]} : vector<8x32xf32> to vector<8x8xf32>
    %171 = vector.shape_cast %170 : vector<8x8xf32> to vector<1x8x8xf32>
    %172 = vector.extract_strided_slice %169 {offsets = [0, 8], sizes = [8, 8], strides = [1, 1]} : vector<8x32xf32> to vector<8x8xf32>
    %173 = vector.shape_cast %172 : vector<8x8xf32> to vector<1x8x8xf32>
    %174 = vector.extract_strided_slice %169 {offsets = [0, 16], sizes = [8, 8], strides = [1, 1]} : vector<8x32xf32> to vector<8x8xf32>
    %175 = vector.shape_cast %174 : vector<8x8xf32> to vector<1x8x8xf32>
    %176 = vector.extract_strided_slice %169 {offsets = [0, 24], sizes = [8, 8], strides = [1, 1]} : vector<8x32xf32> to vector<8x8xf32>
    %177 = vector.shape_cast %176 : vector<8x8xf32> to vector<1x8x8xf32>
    %178 = vector.extract_strided_slice %162 {offsets = [8, 0], sizes = [8, 32], strides = [1, 1]} : vector<16x32xf32> to vector<8x32xf32>
    %179 = vector.extract_strided_slice %178 {offsets = [0, 0], sizes = [8, 8], strides = [1, 1]} : vector<8x32xf32> to vector<8x8xf32>
    %180 = vector.shape_cast %179 : vector<8x8xf32> to vector<1x8x8xf32>
    %181 = vector.extract_strided_slice %178 {offsets = [0, 8], sizes = [8, 8], strides = [1, 1]} : vector<8x32xf32> to vector<8x8xf32>
    %182 = vector.shape_cast %181 : vector<8x8xf32> to vector<1x8x8xf32>
    %183 = vector.extract_strided_slice %178 {offsets = [0, 16], sizes = [8, 8], strides = [1, 1]} : vector<8x32xf32> to vector<8x8xf32>
    %184 = vector.shape_cast %183 : vector<8x8xf32> to vector<1x8x8xf32>
    %185 = vector.extract_strided_slice %178 {offsets = [0, 24], sizes = [8, 8], strides = [1, 1]} : vector<8x32xf32> to vector<8x8xf32>
    %186 = vector.shape_cast %185 : vector<8x8xf32> to vector<1x8x8xf32>
    %187 = tpu.concatenate %171, %173, %175, %177, %180, %182, %184, %186 in 0 : vector<1x8x8xf32>, vector<1x8x8xf32>, vector<1x8x8xf32>, vector<1x8x8xf32>, vector<1x8x8xf32>, vector<1x8x8xf32>, vector<1x8x8xf32>, vector<1x8x8xf32> -> vector<8x8x8xf32>
    %188 = vector.extract_strided_slice %168 {offsets = [0, 0], sizes = [8, 64], strides = [1, 1]} : vector<16x64xf32> to vector<8x64xf32>
    %189 = vector.extract_strided_slice %188 {offsets = [0, 0], sizes = [8, 8], strides = [1, 1]} : vector<8x64xf32> to vector<8x8xf32>
    %190 = vector.shape_cast %189 : vector<8x8xf32> to vector<1x8x8xf32>
    %191 = vector.extract_strided_slice %188 {offsets = [0, 8], sizes = [8, 8], strides = [1, 1]} : vector<8x64xf32> to vector<8x8xf32>
    %192 = vector.shape_cast %191 : vector<8x8xf32> to vector<1x8x8xf32>
    %193 = vector.extract_strided_slice %188 {offsets = [0, 16], sizes = [8, 8], strides = [1, 1]} : vector<8x64xf32> to vector<8x8xf32>
    %194 = vector.shape_cast %193 : vector<8x8xf32> to vector<1x8x8xf32>
    %195 = vector.extract_strided_slice %188 {offsets = [0, 24], sizes = [8, 8], strides = [1, 1]} : vector<8x64xf32> to vector<8x8xf32>
    %196 = vector.shape_cast %195 : vector<8x8xf32> to vector<1x8x8xf32>
    %197 = vector.extract_strided_slice %168 {offsets = [8, 0], sizes = [8, 64], strides = [1, 1]} : vector<16x64xf32> to vector<8x64xf32>
    %198 = vector.extract_strided_slice %197 {offsets = [0, 0], sizes = [8, 8], strides = [1, 1]} : vector<8x64xf32> to vector<8x8xf32>
    %199 = vector.shape_cast %198 : vector<8x8xf32> to vector<1x8x8xf32>
    %200 = vector.extract_strided_slice %197 {offsets = [0, 8], sizes = [8, 8], strides = [1, 1]} : vector<8x64xf32> to vector<8x8xf32>
    %201 = vector.shape_cast %200 : vector<8x8xf32> to vector<1x8x8xf32>
    %202 = vector.extract_strided_slice %197 {offsets = [0, 16], sizes = [8, 8], strides = [1, 1]} : vector<8x64xf32> to vector<8x8xf32>
    %203 = vector.shape_cast %202 : vector<8x8xf32> to vector<1x8x8xf32>
    %204 = vector.extract_strided_slice %197 {offsets = [0, 24], sizes = [8, 8], strides = [1, 1]} : vector<8x64xf32> to vector<8x8xf32>
    %205 = vector.shape_cast %204 : vector<8x8xf32> to vector<1x8x8xf32>
    %206 = tpu.concatenate %190, %192, %194, %196, %199, %201, %203, %205 in 0 : vector<1x8x8xf32>, vector<1x8x8xf32>, vector<1x8x8xf32>, vector<1x8x8xf32>, vector<1x8x8xf32>, vector<1x8x8xf32>, vector<1x8x8xf32>, vector<1x8x8xf32> -> vector<8x8x8xf32>
    %207 = vector.extract_strided_slice %168 {offsets = [0, 0], sizes = [8, 64], strides = [1, 1]} : vector<16x64xf32> to vector<8x64xf32>
    %208 = vector.extract_strided_slice %207 {offsets = [0, 32], sizes = [8, 8], strides = [1, 1]} : vector<8x64xf32> to vector<8x8xf32>
    %209 = vector.shape_cast %208 : vector<8x8xf32> to vector<1x8x8xf32>
    %210 = vector.extract_strided_slice %207 {offsets = [0, 40], sizes = [8, 8], strides = [1, 1]} : vector<8x64xf32> to vector<8x8xf32>
    %211 = vector.shape_cast %210 : vector<8x8xf32> to vector<1x8x8xf32>
    %212 = vector.extract_strided_slice %207 {offsets = [0, 48], sizes = [8, 8], strides = [1, 1]} : vector<8x64xf32> to vector<8x8xf32>
    %213 = vector.shape_cast %212 : vector<8x8xf32> to vector<1x8x8xf32>
    %214 = vector.extract_strided_slice %207 {offsets = [0, 56], sizes = [8, 8], strides = [1, 1]} : vector<8x64xf32> to vector<8x8xf32>
    %215 = vector.shape_cast %214 : vector<8x8xf32> to vector<1x8x8xf32>
    %216 = vector.extract_strided_slice %168 {offsets = [8, 0], sizes = [8, 64], strides = [1, 1]} : vector<16x64xf32> to vector<8x64xf32>
    %217 = vector.extract_strided_slice %216 {offsets = [0, 32], sizes = [8, 8], strides = [1, 1]} : vector<8x64xf32> to vector<8x8xf32>
    %218 = vector.shape_cast %217 : vector<8x8xf32> to vector<1x8x8xf32>
    %219 = vector.extract_strided_slice %216 {offsets = [0, 40], sizes = [8, 8], strides = [1, 1]} : vector<8x64xf32> to vector<8x8xf32>
    %220 = vector.shape_cast %219 : vector<8x8xf32> to vector<1x8x8xf32>
    %221 = vector.extract_strided_slice %216 {offsets = [0, 48], sizes = [8, 8], strides = [1, 1]} : vector<8x64xf32> to vector<8x8xf32>
    %222 = vector.shape_cast %221 : vector<8x8xf32> to vector<1x8x8xf32>
    %223 = vector.extract_strided_slice %216 {offsets = [0, 56], sizes = [8, 8], strides = [1, 1]} : vector<8x64xf32> to vector<8x8xf32>
    %224 = vector.shape_cast %223 : vector<8x8xf32> to vector<1x8x8xf32>
    %225 = tpu.concatenate %209, %211, %213, %215, %218, %220, %222, %224 in 0 : vector<1x8x8xf32>, vector<1x8x8xf32>, vector<1x8x8xf32>, vector<1x8x8xf32>, vector<1x8x8xf32>, vector<1x8x8xf32>, vector<1x8x8xf32>, vector<1x8x8xf32> -> vector<8x8x8xf32>
    %c0_37 = arith.constant 0 : index
    %c224 = arith.constant 224 : index
    %226 = vector.load %arg12[%c0_37, %c224] : memref<1x352xf32, #tpu.memory_space<vmem>>, vector<1x32xf32>
    %227 = arith.truncf %187 : vector<8x8x8xf32> to vector<8x8x8xbf16>
    %228 = arith.truncf %206 : vector<8x8x8xf32> to vector<8x8x8xbf16>
    %cst_38 = arith.constant dense<0.000000e+00> : vector<8x8x8xf32>
    %229 = tpu.matmul %227, %228, %cst_38 {dimension_numbers = #tpu.dot_dimension_numbers<[2], [2], [1], [1], [0, 0, 0, 1, 1, 1], [0], [0]>} : vector<8x8x8xbf16>, vector<8x8x8xbf16>, vector<8x8x8xf32> -> vector<8x8x8xf32>
    %230 = vector.broadcast %25 : vector<8x1x8xf32> to vector<8x8x8xf32>
    %231 = arith.addf %229, %230 : vector<8x8x8xf32>
    %cst_39 = arith.constant dense<0xFF800000> : vector<8x8xf32>
    %232 = vector.multi_reduction <maximumf>, %231, %cst_39 [2] : vector<8x8x8xf32> to vector<8x8xf32>
    %233 = vector.shape_cast %232 : vector<8x8xf32> to vector<8x8x1xf32>
    %234 = vector.broadcast %233 : vector<8x8x1xf32> to vector<8x8x8xf32>
    %235 = arith.subf %231, %234 : vector<8x8x8xf32>
    %236 = math.exp %235 : vector<8x8x8xf32>
    %cst_40 = arith.constant dense<0.000000e+00> : vector<8x8xf32>
    %237 = vector.multi_reduction <add>, %236, %cst_40 [2] : vector<8x8x8xf32> to vector<8x8xf32>
    %238 = vector.shape_cast %237 : vector<8x8xf32> to vector<8x8x1xf32>
    %239 = tpu.reciprocal %238 {approx = true} : vector<8x8x1xf32> -> vector<8x8x1xf32>
    %240 = vector.broadcast %239 : vector<8x8x1xf32> to vector<8x8x8xf32>
    %241 = arith.mulf %236, %240 : vector<8x8x8xf32>
    %242 = arith.truncf %241 : vector<8x8x8xf32> to vector<8x8x8xbf16>
    %243 = arith.truncf %225 : vector<8x8x8xf32> to vector<8x8x8xbf16>
    %cst_41 = arith.constant dense<0.000000e+00> : vector<8x8x8xf32>
    %244 = tpu.matmul %242, %243, %cst_41 {dimension_numbers = #tpu.dot_dimension_numbers<[2], [1], [1], [2], [0, 0, 0, 1, 1, 2], [0], [0]>} : vector<8x8x8xbf16>, vector<8x8x8xbf16>, vector<8x8x8xf32> -> vector<8x8x8xf32>
    %245 = vector.extract_strided_slice %244 {offsets = [0, 0, 0], sizes = [1, 8, 8], strides = [1, 1, 1]} : vector<8x8x8xf32> to vector<1x8x8xf32>
    %246 = vector.shape_cast %245 : vector<1x8x8xf32> to vector<8x8xf32>
    %247 = vector.extract_strided_slice %244 {offsets = [1, 0, 0], sizes = [1, 8, 8], strides = [1, 1, 1]} : vector<8x8x8xf32> to vector<1x8x8xf32>
    %248 = vector.shape_cast %247 : vector<1x8x8xf32> to vector<8x8xf32>
    %249 = vector.extract_strided_slice %244 {offsets = [2, 0, 0], sizes = [1, 8, 8], strides = [1, 1, 1]} : vector<8x8x8xf32> to vector<1x8x8xf32>
    %250 = vector.shape_cast %249 : vector<1x8x8xf32> to vector<8x8xf32>
    %251 = vector.extract_strided_slice %244 {offsets = [3, 0, 0], sizes = [1, 8, 8], strides = [1, 1, 1]} : vector<8x8x8xf32> to vector<1x8x8xf32>
    %252 = vector.shape_cast %251 : vector<1x8x8xf32> to vector<8x8xf32>
    %253 = tpu.concatenate %246, %248, %250, %252 in 1 : vector<8x8xf32>, vector<8x8xf32>, vector<8x8xf32>, vector<8x8xf32> -> vector<8x32xf32>
    %254 = vector.extract_strided_slice %244 {offsets = [4, 0, 0], sizes = [1, 8, 8], strides = [1, 1, 1]} : vector<8x8x8xf32> to vector<1x8x8xf32>
    %255 = vector.shape_cast %254 : vector<1x8x8xf32> to vector<8x8xf32>
    %256 = vector.extract_strided_slice %244 {offsets = [5, 0, 0], sizes = [1, 8, 8], strides = [1, 1, 1]} : vector<8x8x8xf32> to vector<1x8x8xf32>
    %257 = vector.shape_cast %256 : vector<1x8x8xf32> to vector<8x8xf32>
    %258 = vector.extract_strided_slice %244 {offsets = [6, 0, 0], sizes = [1, 8, 8], strides = [1, 1, 1]} : vector<8x8x8xf32> to vector<1x8x8xf32>
    %259 = vector.shape_cast %258 : vector<1x8x8xf32> to vector<8x8xf32>
    %260 = vector.extract_strided_slice %244 {offsets = [7, 0, 0], sizes = [1, 8, 8], strides = [1, 1, 1]} : vector<8x8x8xf32> to vector<1x8x8xf32>
    %261 = vector.shape_cast %260 : vector<1x8x8xf32> to vector<8x8xf32>
    %262 = tpu.concatenate %255, %257, %259, %261 in 1 : vector<8x8xf32>, vector<8x8xf32>, vector<8x8xf32>, vector<8x8xf32> -> vector<8x32xf32>
    %263 = tpu.concatenate %253, %262 in 0 : vector<8x32xf32>, vector<8x32xf32> -> vector<16x32xf32>
    %264 = arith.truncf %263 : vector<16x32xf32> to vector<16x32xbf16>
    %c0_42 = arith.constant 0 : index
    %c0_43 = arith.constant 0 : index
    %265 = vector.load %arg9[%c0_42, %c0_43] : memref<32x32xbf16, #tpu.memory_space<vmem>>, vector<32x32xbf16>
    %cst_44 = arith.constant dense<0.000000e+00> : vector<16x32xf32>
    %266 = tpu.matmul %264, %265, %cst_44 {dimension_numbers = #tpu.dot_dimension_numbers<[1], [0], [0], [1], [0, 0, 1, 1], [], []>} : vector<16x32xbf16>, vector<32x32xbf16>, vector<16x32xf32> -> vector<16x32xf32>
    %267 = vector.broadcast %226 : vector<1x32xf32> to vector<16x32xf32>
    %268 = arith.addf %266, %267 : vector<16x32xf32>
    %269 = arith.addf %156, %268 : vector<16x32xf32>
    %cst_45 = arith.constant dense<0.000000e+00> : vector<16xf32>
    %270 = vector.multi_reduction <add>, %269, %cst_45 [1] : vector<16x32xf32> to vector<16xf32>
    %271 = vector.shape_cast %270 : vector<16xf32> to vector<16x1xf32>
    %cst_46 = arith.constant 3.200000e+01 : f32
    %272 = vector.broadcast %cst_46 : f32 to vector<16x1xf32>
    %273 = arith.divf %271, %272 : vector<16x1xf32>
    %274 = vector.broadcast %273 : vector<16x1xf32> to vector<16x32xf32>
    %275 = arith.subf %269, %274 : vector<16x32xf32>
    %276 = arith.mulf %275, %275 : vector<16x32xf32>
    %cst_47 = arith.constant dense<0.000000e+00> : vector<16xf32>
    %277 = vector.multi_reduction <add>, %276, %cst_47 [1] : vector<16x32xf32> to vector<16xf32>
    %278 = vector.shape_cast %277 : vector<16xf32> to vector<16x1xf32>
    %cst_48 = arith.constant 3.200000e+01 : f32
    %279 = vector.broadcast %cst_48 : f32 to vector<16x1xf32>
    %280 = arith.divf %278, %279 : vector<16x1xf32>
    %281 = vector.broadcast %273 : vector<16x1xf32> to vector<16x32xf32>
    %282 = arith.subf %269, %281 : vector<16x32xf32>
    %cst_49 = arith.constant 9.99999974E-6 : f32
    %283 = vector.broadcast %cst_49 : f32 to vector<16x1xf32>
    %284 = arith.addf %280, %283 : vector<16x1xf32>
    %285 = math.rsqrt %284 : vector<16x1xf32>
    %286 = vector.broadcast %285 : vector<16x1xf32> to vector<16x32xf32>
    %287 = arith.mulf %282, %286 : vector<16x32xf32>
    %c2 = arith.constant 2 : index
    %c0_50 = arith.constant 0 : index
    %288 = vector.load %arg13[%c2, %c0_50] : memref<6x32xf32, #tpu.memory_space<vmem>>, vector<1x32xf32>
    %289 = vector.broadcast %288 : vector<1x32xf32> to vector<16x32xf32>
    %290 = arith.mulf %287, %289 : vector<16x32xf32>
    %c3 = arith.constant 3 : index
    %c0_51 = arith.constant 0 : index
    %291 = vector.load %arg13[%c3, %c0_51] : memref<6x32xf32, #tpu.memory_space<vmem>>, vector<1x32xf32>
    %292 = vector.broadcast %291 : vector<1x32xf32> to vector<16x32xf32>
    %293 = arith.addf %290, %292 : vector<16x32xf32>
    %294 = arith.truncf %293 : vector<16x32xf32> to vector<16x32xbf16>
    %c0_52 = arith.constant 0 : index
    %c0_53 = arith.constant 0 : index
    %295 = vector.load %arg10[%c0_52, %c0_53] : memref<32x64xbf16, #tpu.memory_space<vmem>>, vector<32x64xbf16>
    %cst_54 = arith.constant dense<0.000000e+00> : vector<16x64xf32>
    %296 = tpu.matmul %294, %295, %cst_54 {dimension_numbers = #tpu.dot_dimension_numbers<[1], [0], [0], [1], [0, 0, 1, 1], [], []>} : vector<16x32xbf16>, vector<32x64xbf16>, vector<16x64xf32> -> vector<16x64xf32>
    %c0_55 = arith.constant 0 : index
    %c256 = arith.constant 256 : index
    %297 = vector.load %arg12[%c0_55, %c256] : memref<1x352xf32, #tpu.memory_space<vmem>>, vector<1x64xf32>
    %298 = vector.broadcast %297 : vector<1x64xf32> to vector<16x64xf32>
    %299 = arith.addf %296, %298 : vector<16x64xf32>
    %cst_56 = arith.constant 0.000000e+00 : f32
    %300 = vector.broadcast %cst_56 : f32 to vector<16x64xf32>
    %301 = arith.maximumf %299, %300 : vector<16x64xf32>
    %302 = arith.truncf %301 : vector<16x64xf32> to vector<16x64xbf16>
    %c0_57 = arith.constant 0 : index
    %c0_58 = arith.constant 0 : index
    %303 = vector.load %arg11[%c0_57, %c0_58] : memref<64x32xbf16, #tpu.memory_space<vmem>>, vector<64x32xbf16>
    %cst_59 = arith.constant dense<0.000000e+00> : vector<16x32xf32>
    %304 = tpu.matmul %302, %303, %cst_59 {dimension_numbers = #tpu.dot_dimension_numbers<[1], [0], [0], [1], [0, 0, 1, 1], [], []>} : vector<16x64xbf16>, vector<64x32xbf16>, vector<16x32xf32> -> vector<16x32xf32>
    %c0_60 = arith.constant 0 : index
    %c320 = arith.constant 320 : index
    %305 = vector.load %arg12[%c0_60, %c320] : memref<1x352xf32, #tpu.memory_space<vmem>>, vector<1x32xf32>
    %306 = vector.broadcast %305 : vector<1x32xf32> to vector<16x32xf32>
    %307 = arith.addf %304, %306 : vector<16x32xf32>
    %308 = arith.addf %293, %307 : vector<16x32xf32>
    %cst_61 = arith.constant dense<0.000000e+00> : vector<16xf32>
    %309 = vector.multi_reduction <add>, %308, %cst_61 [1] : vector<16x32xf32> to vector<16xf32>
    %310 = vector.shape_cast %309 : vector<16xf32> to vector<16x1xf32>
    %cst_62 = arith.constant 3.200000e+01 : f32
    %311 = vector.broadcast %cst_62 : f32 to vector<16x1xf32>
    %312 = arith.divf %310, %311 : vector<16x1xf32>
    %313 = vector.broadcast %312 : vector<16x1xf32> to vector<16x32xf32>
    %314 = arith.subf %308, %313 : vector<16x32xf32>
    %315 = arith.mulf %314, %314 : vector<16x32xf32>
    %cst_63 = arith.constant dense<0.000000e+00> : vector<16xf32>
    %316 = vector.multi_reduction <add>, %315, %cst_63 [1] : vector<16x32xf32> to vector<16xf32>
    %317 = vector.shape_cast %316 : vector<16xf32> to vector<16x1xf32>
    %cst_64 = arith.constant 3.200000e+01 : f32
    %318 = vector.broadcast %cst_64 : f32 to vector<16x1xf32>
    %319 = arith.divf %317, %318 : vector<16x1xf32>
    %320 = vector.broadcast %312 : vector<16x1xf32> to vector<16x32xf32>
    %321 = arith.subf %308, %320 : vector<16x32xf32>
    %cst_65 = arith.constant 9.99999974E-6 : f32
    %322 = vector.broadcast %cst_65 : f32 to vector<16x1xf32>
    %323 = arith.addf %319, %322 : vector<16x1xf32>
    %324 = math.rsqrt %323 : vector<16x1xf32>
    %325 = vector.broadcast %324 : vector<16x1xf32> to vector<16x32xf32>
    %326 = arith.mulf %321, %325 : vector<16x32xf32>
    %c4 = arith.constant 4 : index
    %c0_66 = arith.constant 0 : index
    %327 = vector.load %arg13[%c4, %c0_66] : memref<6x32xf32, #tpu.memory_space<vmem>>, vector<1x32xf32>
    %328 = vector.broadcast %327 : vector<1x32xf32> to vector<16x32xf32>
    %329 = arith.mulf %326, %328 : vector<16x32xf32>
    %c5 = arith.constant 5 : index
    %c0_67 = arith.constant 0 : index
    %330 = vector.load %arg13[%c5, %c0_67] : memref<6x32xf32, #tpu.memory_space<vmem>>, vector<1x32xf32>
    %331 = vector.broadcast %330 : vector<1x32xf32> to vector<16x32xf32>
    %332 = arith.addf %329, %331 : vector<16x32xf32>
    %c0_68 = arith.constant 0 : index
    %c0_69 = arith.constant 0 : index
    %333 = vector.load %arg14[%c0_68, %c0_69] : memref<16x32xf32, #tpu.memory_space<vmem>>, vector<16x32xf32>
    tpu.vector_store %arg14[%c0_68, %c0_69], %332 {strides = array<i32>} : memref<16x32xf32, #tpu.memory_space<vmem>>, vector<16x32xf32>,
    return
  }
  func.func @transform_0(%arg0: i32) -> (i32, i32) {
    %c0_i32 = arith.constant 0 : i32
    %c0_i32_0 = arith.constant 0 : i32
    %c0_i32_1 = arith.constant 0 : i32
    return %c0_i32, %c0_i32_0 : i32, i32
  }
  func.func @transform_1(%arg0: i32) -> (i32, i32) {
    %c0_i32 = arith.constant 0 : i32
    %c0_i32_0 = arith.constant 0 : i32
    %c0_i32_1 = arith.constant 0 : i32
    return %c0_i32, %c0_i32_0 : i32, i32
  }
  func.func @transform_2(%arg0: i32) -> (i32, i32) {
    %c0_i32 = arith.constant 0 : i32
    %c0_i32_0 = arith.constant 0 : i32
    %c0_i32_1 = arith.constant 0 : i32
    return %c0_i32, %c0_i32_0 : i32, i32
  }
  func.func @transform_3(%arg0: i32) -> (i32, i32) {
    %c0_i32 = arith.constant 0 : i32
    %c0_i32_0 = arith.constant 0 : i32
    %c0_i32_1 = arith.constant 0 : i32
    return %c0_i32, %c0_i32_0 : i32, i32
  }
  func.func @transform_4(%arg0: i32) -> (i32, i32) {
    %c0_i32 = arith.constant 0 : i32
    %c0_i32_0 = arith.constant 0 : i32
    %c0_i32_1 = arith.constant 0 : i32
    return %c0_i32, %c0_i32_0 : i32, i32
  }
  func.func @transform_5(%arg0: i32) -> (i32, i32) {
    %c0_i32 = arith.constant 0 : i32
    %c0_i32_0 = arith.constant 0 : i32
    %c0_i32_1 = arith.constant 0 : i32
    return %c0_i32, %c0_i32_0 : i32, i32
  }
  func.func @transform_6(%arg0: i32) -> (i32, i32) {
    %c0_i32 = arith.constant 0 : i32
    %c0_i32_0 = arith.constant 0 : i32
    %c0_i32_1 = arith.constant 0 : i32
    return %c0_i32, %c0_i32_0 : i32, i32
  }
  func.func @transform_7(%arg0: i32) -> (i32, i32) {
    %c0_i32 = arith.constant 0 : i32
    %c0_i32_0 = arith.constant 0 : i32
    %c0_i32_1 = arith.constant 0 : i32
    return %c0_i32, %c0_i32_0 : i32, i32
  }
  func.func @transform_8(%arg0: i32) -> (i32, i32) {
    %c0_i32 = arith.constant 0 : i32
    %c0_i32_0 = arith.constant 0 : i32
    %c0_i32_1 = arith.constant 0 : i32
    return %c0_i32, %c0_i32_0 : i32, i32
  }
  func.func @transform_9(%arg0: i32) -> (i32, i32) {
    %c0_i32 = arith.constant 0 : i32
    %c0_i32_0 = arith.constant 0 : i32
    %c0_i32_1 = arith.constant 0 : i32
    return %c0_i32, %c0_i32_0 : i32, i32
  }
  func.func @transform_10(%arg0: i32) -> (i32, i32) {
    %c0_i32 = arith.constant 0 : i32
    %c0_i32_0 = arith.constant 0 : i32
    %c0_i32_1 = arith.constant 0 : i32
    return %c0_i32, %c0_i32_0 : i32, i32
  }
  func.func @transform_11(%arg0: i32) -> (i32, i32) {
    %c0_i32 = arith.constant 0 : i32
    %c0_i32_0 = arith.constant 0 : i32
    %c0_i32_1 = arith.constant 0 : i32
    return %c0_i32, %c0_i32_0 : i32, i32
  }
  func.func @transform_12(%arg0: i32) -> (i32, i32) {
    %c0_i32 = arith.constant 0 : i32
    %c0_i32_0 = arith.constant 0 : i32
    %c0_i32_1 = arith.constant 0 : i32
    return %c0_i32, %c0_i32_0 : i32, i32
  }
  func.func @transform_13(%arg0: i32) -> (i32, i32) {
    %c0_i32 = arith.constant 0 : i32
    %c0_i32_0 = arith.constant 0 : i32
    %c0_i32_1 = arith.constant 0 : i32
    return %c0_i32, %c0_i32_0 : i32, i32
  }
}

</mosaic_0001>

<bundles_post_ra>
// kernel: decoder_layer.1
= control target key start
LH: loop header
LB: loop body
LE: loop exit
PB: predicated region body
PF: predicated region fallthrough
CT: control target
= control target key end

     0   :  { %18 = vsyncpa [#allocation3], 0  ;;  %s3965_s0 = inlined_call_operand.vmem [shape: f32[16,32], index: 0, kind: input, shape index: {}]   ;;  %s3966_s1 = inlined_call_operand.vmem [shape: f32[16,32], index: 1, kind: input, shape index: {}]   ;;  %s3967_s2 = inlined_call_operand.vmem [shape: f32[8,8], index: 2, kind: input, shape index: {}]   ;;  %s3968_s3 = inlined_call_operand.vmem [shape: f32[2,8], index: 3, kind: input, shape index: {}]   ;;  %s3969_s4 = inlined_call_operand.vmem [shape: bf16[32,96], index: 4, kind: input, shape index: {}]   ;;  %s3970_s5 = inlined_call_operand.vmem [shape: bf16[32,32], index: 5, kind: input, shape index: {}]   ;;  %s3971_s6 = inlined_call_operand.hbm [shape: bf16[32,32], index: 6, kind: input, shape index: {}]   ;;  %s3972_s7 = inlined_call_operand.hbm [shape: bf16[32,64], index: 7, kind: input, shape index: {}]   ;;  %s3973_s8 = inlined_call_operand.hbm [shape: bf16[32,32], index: 8, kind: input, shape index: {}]   ;;  %s3974_s9 = inlined_call_operand.hbm [shape: bf16[32,64], index: 9, kind: input, shape index: {}]   ;;  %s3975_s10 = inlined_call_operand.vmem [shape: bf16[64,32], index: 10, kind: input, shape index: {}]   ;;  %s3976_s11 = inlined_call_operand.hbm [shape: f32[1,352], index: 11, kind: input, shape index: {}]   ;;  %s3977_s12 = inlined_call_operand.hbm [shape: f32[6,32], index: 12, kind: input, shape index: {}]   ;;  %s3978_s13 = inlined_call_operand.hbm [shape: f32[16,32], index: 13, kind: output, shape index: {}]  }
   0x1   :  { %19 = vsyncpa [#allocation6], 0 }
   0x2   :  { %20 = vsyncpa [#allocation9], 0 }
   0x3   :  { %21 = vsyncpa [#allocation12], 0 }
   0x4   :  { %22 = vsyncpa [#allocation4], 0  ;;  %s3343_s25 = smov [#allocation5]   ;;  %s3344_s27 = smov [#allocation8]  }
   0x5   :  { %s52_s26 = sshll.u32 %s3343_s25, 4  ;;  %s76_s28 = sshll.u32 %s3344_s27, 4  ;;  %s53_s26 = int_to_ptr.vmem [resolvable:$true] %s52_s26  ;;  %s77_s28 = int_to_ptr.vmem [resolvable:$true] %s76_s28 }
   0x6   :  { %s3201_s29 = scalar_lea.vmem %s53_s26, 256  ;;  %p3206_p1 = scmp.lt.s32.totalorder %s53_s26, %s53_s26 }
   0x7   :  { %p3202_p0 = scmp.ne.s32.totalorder %s53_s26, %s3201_s29  ;;  %p3207_p2 = scmp.lt.s32.totalorder %s3201_s29, %s3201_s29 }
   0x9   :  { %p3208_p3 = por %p3207_p2, %p3206_p1 }
   0xb   :  { %p3209_p4 = pnand %p3208_p3, %p3202_p0 }
   0xd   :  { %3212 = shalt.err (!%p3209_p4)
}
   0xe   :  { %s3345_s30 = smov 64   ;;  %s3346_s14 = smov 4  }
   0xf   :  { %58 = dma.hbm_to_vmem [thread:$0]  %s3972_s7, 256, %s53_s26, [#allocation6], %s3345_s30, %s3345_s30, %s3346_s14  }
  0x10   :  { %s3221_s17 = scalar_lea.vmem %s77_s28, 256  ;;  %p3226_p6 = scmp.lt.s32.totalorder %s77_s28, %s77_s28 }
  0x11   :  { %p3222_p5 = scmp.ne.s32.totalorder %s77_s28, %s3221_s17  ;;  %p3227_p7 = scmp.lt.s32.totalorder %s3221_s17, %s3221_s17 }
  0x13   :  { %p3228_p8 = por %p3227_p7, %p3226_p6 }
  0x15   :  { %p3229_p9 = pnand %p3228_p8, %p3222_p5 }
  0x17   :  { %3232 = shalt.err (!%p3229_p9)
}
  0x18   :  { %82 = dma.hbm_to_vmem [thread:$0]  %s3974_s9, 256, %s77_s28, [#allocation9], %s3345_s30, %s3345_s30, %s3346_s14  }
  0x19   :  { %s3347_s20 = smov [#allocation2]   ;;  %s3348_s22 = smov [#allocation7]  }
  0x1a   :  { %s40_s21 = sshll.u32 %s3347_s20, 4  ;;  %s64_s23 = sshll.u32 %s3348_s22, 4  ;;  %s41_s21 = int_to_ptr.vmem [resolvable:$true] %s40_s21  ;;  %s65_s23 = int_to_ptr.vmem [resolvable:$true] %s64_s23 }
  0x1b   :  { %s3241_s7 = scalar_lea.vmem %s41_s21, 256  ;;  %p3246_p11 = scmp.lt.s32.totalorder %s41_s21, %s41_s21 }
  0x1c   :  { %p3242_p10 = scmp.ne.s32.totalorder %s41_s21, %s3241_s7  ;;  %p3247_p12 = scmp.lt.s32.totalorder %s3241_s7, %s3241_s7 }
  0x1e   :  { %p3248_p13 = por %p3247_p12, %p3246_p11 }
  0x20   :  { %p3249_p0 = pnand %p3248_p13, %p3242_p10 }
  0x22   :  { %3252 = shalt.err (!%p3249_p0)
}
  0x23   :  { %46 = dma.hbm_to_vmem [thread:$0]  %s3971_s6, 256, %s41_s21, [#allocation3], %s3345_s30, %s3345_s30, %s3346_s14  }
  0x24   :  { %s3261_s9 = scalar_lea.vmem %s65_s23, 256  ;;  %p3266_p2 = scmp.lt.s32.totalorder %s65_s23, %s65_s23 }
  0x25   :  { %p3262_p1 = scmp.ne.s32.totalorder %s65_s23, %s3261_s9  ;;  %p3267_p3 = scmp.lt.s32.totalorder %s3261_s9, %s3261_s9 }
  0x27   :  { %p3268_p4 = por %p3267_p3, %p3266_p2 }
  0x29   :  { %p3269_p5 = pnand %p3268_p4, %p3262_p1 }
  0x2b   :  { %3272 = shalt.err (!%p3269_p5)
}
  0x2c   :  { %70 = dma.hbm_to_vmem [thread:$0]  %s3973_s8, 256, %s65_s23, [#allocation6], %s3345_s30, %s3345_s30, %s3346_s14  }
  0x2d   :  { %s3349_s28 = smov [#allocation10]   ;;  %s3350_s15 = smov [#allocation11]  }
  0x2e   :  { %s91_s29 = sshll.u32 %s3349_s28, 4  ;;  %s101_s16 = sshll.u32 %s3350_s15, 4  ;;  %s92_s29 = int_to_ptr.vmem [resolvable:$true] %s91_s29  ;;  %s102_s16 = int_to_ptr.vmem [resolvable:$true] %s101_s16 }
  0x2f   :  { %s3281_s6 = scalar_lea.vmem %s92_s29, 48  ;;  %s3285_s17 = scalar_lea.vmem %s92_s29, 64 }
  0x30   :  { %p3282_p6 = scmp.ne.s32.totalorder %s92_s29, %s3281_s6  ;;  %p3286_p7 = scmp.lt.s32.totalorder %s92_s29, %s92_s29 }
  0x31   :  { %p3287_p8 = scmp.lt.s32.totalorder %s3285_s17, %s3281_s6 }
  0x33   :  { %p3288_p9 = por %p3287_p8, %p3286_p7 }
  0x35   :  { %p3289_p10 = pnand %p3288_p9, %p3282_p6 }
  0x37   :  { %3292 = shalt.err (!%p3289_p10)
}
  0x38   :  { %94 = dma.hbm_to_vmem [thread:$0]  %s3976_s11, 48, %s92_s29, [#allocation9]  }
  0x39   :  { %s3301_s20 = scalar_lea.vmem %s102_s16, 128  ;;  %p3306_p12 = scmp.lt.s32.totalorder %s102_s16, %s102_s16 }
  0x3a   :  { %p3302_p11 = scmp.ne.s32.totalorder %s102_s16, %s3301_s20  ;;  %p3307_p13 = scmp.lt.s32.totalorder %s3301_s20, %s3301_s20 }
  0x3c   :  { %p3308_p0 = por %p3307_p13, %p3306_p12 }
  0x3e   :  { %p3309_p1 = pnand %p3308_p0, %p3302_p11 }
  0x40   :  { %3312 = shalt.err (!%p3309_p1)
}
  0x41   :  { %104 = dma.hbm_to_vmem [thread:$0]  %s3977_s12, 128, %s102_s16, [#allocation12]  }
  0x42   :  { %3333 = dma.done.wait [#allocation3], 256  }
  0x43   :  { %3334 = vsyncadd [#allocation3], 4294967040 }
  0x44   :  { %3335 = dma.done.wait [#allocation6], 512  }
  0x45   :  { %3336 = vsyncadd [#allocation6], 4294966784 }
  0x46   :  { %3337 = dma.done.wait [#allocation9], 304  }
  0x47   :  { %3338 = vsyncadd [#allocation9], 4294966992 }
  0x48   :  { %3339 = dma.done.wait [#allocation12], 128  }
  0x49   :  { %3340 = vsyncadd [#allocation12], 4294967168  ;;  %v3351_v0 = vmov 0.0   ;;  %vm3352_vm0 = vmmov 0   ;;  %v3101_v1 = vld [vmem:[%s3969_s4 + $0x8] sm:$0xff]   ;;  %v3102_v2 = vld [vmem:[%s3969_s4] sm:$0xff]  }
  0x4a   :  { %2799 = vmatprep.subr.bf16.mxu1 %v3351_v0  ;;  %2803 = vmatprep.mubr.msk.bf16.mxu1 %vm3352_vm0, %v3351_v0  ;;  %v3478_v3 = vld [vmem:[%s3965_s0] sm:$0xff]  ;;  %v3483_v4 = vld [vmem:[%s3965_s0 + $0x8] sm:$0xff]  ;;  %vm159_vm1 = vcmask 261120   ;;  %s3353_s0 = smov 104   ;;  %s3354_s4 = smov 120   ;;  %vm235_vm2 = vcmask 64512  }
  0x4b   :  { %2813 = vmatprep.subr.bf16.mxu0 %v3351_v0  ;;  %2815 = vmatprep.mubr.msk.bf16.mxu0 %vm3352_vm0, %v3351_v0  ;;  %v135_v5 = vpack.c.bf16 %v3483_v4, %v3478_v3  ;;  %v3492_v6 = vld [vmem:[#allocation10] ss:$0 sm:$0xff]  ;;  %s3355_s9 = smov 112   ;;  %s3356_s26 = smov 96   ;;  %vm726_vm3 = vcmask 1043456   ;;  %vm1119_vm4 = vcmask 130048  }
  0x4c   :  { %2800 = vmatpush3.bf16.msra.mxu1 %v3101_v1  ;;  %v128_v45 = vld [vmem:[%s3967_s2] sm:$0xff]  ;;  %s3357_s6 = smov 8   ;;  %s3358_s17 = smov 16   ;;  %vm1121_vm5 = vcmask 195584   ;;  %vm2539_vm6 = vcmask 523264  }
  0x4d   :  { %2801 = vmatprep.subr.bf16.mxu1 %v3351_v0  ;;  %v129_v46 = vmul.f32 -1e+09, %v128_v45  ;;  %s3360_s18 = smov 32  }
  0x50   :  { %2802 = vmatpush3.bf16.msra.mxu1 %v3102_v2 }
  0x51   :  { %2807 = vmatprep.subr.bf16.mxu1 %v3351_v0 }
  0x53   :  { %2804 = vmatmul.mubr.msk.bf16.vlgmr.msra.gmra.mxu1 %vm159_vm1, %v135_v5 }
  0x54   :  { %2809 = vmatprep.mubr.msk.bf16.mxu1 %vm3352_vm0, %v3351_v0 }
 0x113   :  { %v197_v7 = vpop.f32.mrf.mxu1 }
 0x114   :  { %v198_v8 = vadd.f32 %v3492_v6, %v197_v7 }
 0x115   :  { %v2805_v9 = vpop.f32.mrf.mxu1 }
 0x116   :  { %211 = vrot.lane.b32.xlu1 %v198_v8, %s3353_s0  ;;  %205 = vrot.lane.b32.xlu0 %v198_v8, %s3354_s4  ;;  %v224_v13 = vpack.c.bf16 %v198_v8, %v198_v8 }
 0x117   :  { %v200_v10 = vpop.f32.mrf.mxu1 }
 0x118   :  { %v201_v11 = vadd.f32 %v3492_v6, %v200_v10 }
 0x119   :  { %v2806_v12 = vpop.f32.mrf.mxu1 }
 0x11a   :  { %208 = vrot.lane.b32.xlu0 %v198_v8, %s3355_s9  ;;  %215 = vrot.lane.b32.xlu1 %v201_v11, %s3354_s4  ;;  %v3517_v23 = vpack.c.bf16 %v201_v11, %v201_v11 }
 0x11e   :  { %218 = vrot.lane.b32.xlu0 %v201_v11, %s3355_s9  ;;  %221 = vrot.lane.b32.xlu1 %v201_v11, %s3353_s0 }
 0x122   :  { %233 = vrot.lane.b32.xlu0 %v224_v13, %s3356_s26 }
 0x188   :  { %v212_v14 = vpop.permute.xlu1 %211  ;;  %v206_v15 = vpop.permute.xlu0 %205 }
 0x189   :  { %v3503_v16 = vpack.c.bf16 %v206_v15, %v206_v15  ;;  %v3507_v19 = vpack.c.bf16 %v212_v14, %v212_v14 }
 0x18b   :  { %283 = vrot.lane.b32.xlu1 %v3503_v16, %s3356_s26 }
 0x18c   :  { %v209_v17 = vpop.permute.xlu0 %208  ;;  %v216_v18 = vpop.permute.xlu1 %215 }
 0x18d   :  { %v3509_v20 = vpack.c.bf16 %v209_v17, %v209_v17  ;;  %v3515_v22 = vpack.c.bf16 %v216_v18, %v216_v18 }
 0x18f   :  { %332 = vrot.lane.b32.xlu0 %v3509_v20, %s3356_s26  ;;  %381 = vrot.lane.b32.xlu1 %v3507_v19, %s3356_s26 }
 0x190   :  { %v219_v21 = vpop.permute.xlu0 %218  ;;  %v222_v24 = vpop.permute.xlu1 %221 }
 0x191   :  { %v3523_v26 = vpack.c.bf16 %v219_v21, %v219_v21  ;;  %v3525_v27 = vpack.c.bf16 %v222_v24, %v222_v24 }
 0x193   :  { %479 = vrot.lane.b32.xlu1 %v3515_v22, %s3356_s26  ;;  %430 = vrot.lane.b32.xlu0 %v3517_v23, %s3356_s26 }
 0x194   :  { %v234_v25 = vpop.permute.xlu0 %233 }
 0x195   :  { %v240_v28 = vsel %vm235_vm2, %v234_v25, 0 }
 0x196   :  { %2808 = vmatpush3.bf16.xpose.msra.mxu1 %v240_v28 }
 0x197   :  { %577 = vrot.lane.b32.xlu1 %v3525_v27, %s3356_s26  ;;  %528 = vrot.lane.b32.xlu0 %v3523_v26, %s3356_s26 }
 0x198   :  { %2819 = vmatprep.subr.bf16.mxu1 %v3351_v0 }
 0x19b   :  { %721 = vrot.lane.b32.xlu1 %v224_v13, %s3345_s30 }
 0x19d   :  { %2810 = vmatmul.mubr.msk.bf16.vlgmr.msra.gmra.mxu1 %vm235_vm2, %v224_v13 }
 0x19e   :  { %2821 = vmatprep.mubr.msk.bf16.mxu1 %vm3352_vm0, %v3351_v0 }
 0x1fd   :  { %v284_v29 = vpop.permute.xlu1 %283 }
 0x1fe   :  { %v289_v30 = vsel %vm235_vm2, %v284_v29, 0 }
 0x1ff   :  { %2814 = vmatpush3.bf16.xpose.msra.mxu0 %v289_v30 }
 0x200   :  { %2825 = vmatprep.subr.bf16.mxu0 %v3351_v0 }
 0x201   :  { %v333_v31 = vpop.permute.xlu0 %332  ;;  %v382_v33 = vpop.permute.xlu1 %381 }
 0x202   :  { %v338_v32 = vsel %vm235_vm2, %v333_v31, 0  ;;  %v387_v34 = vsel %vm235_vm2, %v382_v33, 0 }
 0x203   :  { %2820 = vmatpush3.bf16.xpose.msra.mxu1 %v338_v32 }
 0x204   :  { %2831 = vmatprep.subr.bf16.mxu1 %v3351_v0 }
 0x205   :  { %v431_v35 = vpop.permute.xlu0 %430  ;;  %v480_v37 = vpop.permute.xlu1 %479 }
 0x206   :  { %2816 = vmatmul.mubr.msk.bf16.vlgmr.msra.gmra.mxu0 %vm235_vm2, %v3503_v16  ;;  %v436_v36 = vsel %vm235_vm2, %v431_v35, 0  ;;  %v485_v38 = vsel %vm235_vm2, %v480_v37, 0 }
 0x207   :  { %2826 = vmatpush3.bf16.xpose.msra.mxu0 %v387_v34  ;;  %2827 = vmatprep.mubr.msk.bf16.mxu0 %vm3352_vm0, %v3351_v0 }
 0x208   :  { %2837 = vmatprep.subr.bf16.mxu0 %v3351_v0 }
 0x209   :  { %v529_v39 = vpop.permute.xlu0 %528  ;;  %v578_v40 = vpop.permute.xlu1 %577 }
 0x20a   :  { %2822 = vmatmul.mubr.msk.bf16.vlgmr.msra.gmra.mxu1 %vm235_vm2, %v3509_v20  ;;  %v534_v41 = vsel %vm235_vm2, %v529_v39, 0  ;;  %v583_v42 = vsel %vm235_vm2, %v578_v40, 0 }
 0x20b   :  { %2832 = vmatpush3.bf16.xpose.msra.mxu1 %v436_v36  ;;  %2833 = vmatprep.mubr.msk.bf16.mxu1 %vm3352_vm0, %v3351_v0 }
 0x20c   :  { %2843 = vmatprep.subr.bf16.mxu1 %v3351_v0 }
 0x20d   :  { %v722_v43 = vpop.permute.xlu1 %721 }
 0x20e   :  { %2828 = vmatmul.mubr.msk.bf16.vlgmr.msra.gmra.mxu0 %vm235_vm2, %v3507_v19  ;;  %v728_v44 = vsel %vm726_vm3, %v722_v43, 0 }
 0x20f   :  { %2838 = vmatpush3.bf16.xpose.msra.mxu0 %v485_v38  ;;  %2839 = vmatprep.mubr.msk.bf16.mxu0 %vm3352_vm0, %v3351_v0 }
 0x210   :  { %2849 = vmatprep.subr.bf16.mxu0 %v3351_v0 }
 0x212   :  { %2834 = vmatmul.mubr.msk.bf16.vlgmr.msra.gmra.mxu1 %vm235_vm2, %v3517_v23 }
 0x213   :  { %2844 = vmatpush3.bf16.xpose.msra.mxu1 %v534_v41  ;;  %2845 = vmatprep.mubr.msk.bf16.mxu1 %vm3352_vm0, %v3351_v0 }
 0x214   :  { %2855 = vmatprep.subr.bf16.mxu1 %v3351_v0 }
 0x216   :  { %2840 = vmatmul.mubr.msk.bf16.vlgmr.msra.gmra.mxu0 %vm235_vm2, %v3515_v22 }
 0x217   :  { %2850 = vmatpush3.bf16.xpose.msra.mxu0 %v583_v42  ;;  %2851 = vmatprep.mubr.msk.bf16.mxu0 %vm3352_vm0, %v3351_v0 }
 0x218   :  { %2861 = vmatprep.subr.bf16.mxu0 %v3351_v0 }
 0x21a   :  { %2846 = vmatmul.mubr.msk.bf16.vlgmr.msra.gmra.mxu1 %vm235_vm2, %v3523_v26 }
 0x21b   :  { %2856 = vmatpush3.bf16.msra.mxu1 %v728_v44  ;;  %2857 = vmatprep.mubr.msk.bf16.mxu1 %vm3352_vm0, %v3351_v0 }
 0x21c   :  { %2867 = vmatprep.subr.bf16.mxu1 %v3351_v0 }
 0x21e   :  { %2852 = vmatmul.mubr.msk.bf16.vlgmr.msra.gmra.mxu0 %vm235_vm2, %v3525_v27 }
 0x21f   :  { %2863 = vmatprep.mubr.msk.bf16.mxu0 %vm3352_vm0, %v3351_v0 }
 0x25d   :  { %v276_v47 = vpop.f32.mrf.mxu1 }
 0x25e   :  { %v277_v48 = vadd.f32 %v276_v47, %v129_v46 }
 0x25f   :  { %v2811_v49 = vpop.f32.mrf.mxu1 }
 0x260   :  { %v625_v50 = vsel %vm235_vm2, %v277_v48, -inf }
 0x261   :  { %626 = vmax.xlane.f32.xlu0 %v625_v50  ;;  %v279_v51 = vpop.f32.mrf.mxu1 }
 0x263   :  { %v2812_v52 = vpop.f32.mrf.mxu1 }
 0x2c6   :  { %v325_v53 = vpop.f32.mrf.mxu0 }
 0x2c7   :  { %v326_v54 = vadd.f32 %v325_v53, %v129_v46 }
 0x2c8   :  { %v2817_v55 = vpop.f32.mrf.mxu0 }
 0x2c9   :  { %v628_v56 = vsel %vm235_vm2, %v326_v54, -inf }
 0x2ca   :  { %629 = vmax.xlane.f32.xlu1 %v628_v56  ;;  %v328_v57 = vpop.f32.mrf.mxu0  ;;  %v374_v58 = vpop.f32.mrf.mxu1 }
 0x2cb   :  { %v375_v59 = vadd.f32 %v374_v58, %v129_v46 }
 0x2cc   :  { %v2818_v60 = vpop.f32.mrf.mxu0  ;;  %v2823_v61 = vpop.f32.mrf.mxu1 }
 0x2cd   :  { %v631_v62 = vsel %vm235_vm2, %v375_v59, -inf }
 0x2ce   :  { %v423_v63 = vpop.f32.mrf.mxu0  ;;  %632 = vmax.xlane.f32.xlu0 %v631_v62  ;;  %v377_v1 = vpop.f32.mrf.mxu1 }
 0x2cf   :  { %v424_v2 = vadd.f32 %v423_v63, %v129_v46 }
 0x2d0   :  { %v2824_v5 = vpop.f32.mrf.mxu1  ;;  %v2829_v7 = vpop.f32.mrf.mxu0 }
 0x2d1   :  { %v634_v8 = vsel %vm235_vm2, %v424_v2, -inf }
 0x2d2   :  { %v426_v9 = vpop.f32.mrf.mxu0  ;;  %635 = vmax.xlane.f32.xlu0 %v634_v8  ;;  %v472_v10 = vpop.f32.mrf.mxu1 }
 0x2d3   :  { %v3588_v11 = vadd.f32 %v472_v10, %v129_v46 }
 0x2d4   :  { %v2830_v12 = vpop.f32.mrf.mxu0  ;;  %v2835_v13 = vpop.f32.mrf.mxu1 }
 0x2d5   :  { %v637_v14 = vsel %vm235_vm2, %v3588_v11, -inf }
 0x2d6   :  { %v521_v15 = vpop.f32.mrf.mxu0  ;;  %638 = vmax.xlane.f32.xlu1 %v637_v14  ;;  %v475_v17 = vpop.f32.mrf.mxu1 }
 0x2d7   :  { %v3592_v18 = vadd.f32 %v521_v15, %v129_v46 }
 0x2d8   :  { %v2836_v21 = vpop.f32.mrf.mxu1  ;;  %v2841_v24 = vpop.f32.mrf.mxu0 }
 0x2d9   :  { %v640_v25 = vsel %vm235_vm2, %v3592_v18, -inf }
 0x2da   :  { %v524_v28 = vpop.f32.mrf.mxu0  ;;  %641 = vmax.xlane.f32.xlu0 %v640_v25  ;;  %v570_v29 = vpop.f32.mrf.mxu1 }
 0x2db   :  { %v571_v30 = vadd.f32 %v570_v29, %v129_v46 }
 0x2dc   :  { %v2842_v31 = vpop.f32.mrf.mxu0  ;;  %v2847_v32 = vpop.f32.mrf.mxu1 }
 0x2dd   :  { %v643_v33 = vsel %vm235_vm2, %v571_v30, -inf }
 0x2de   :  { %v619_v34 = vpop.f32.mrf.mxu0  ;;  %644 = vmax.xlane.f32.xlu1 %v643_v33  ;;  %v573_v35 = vpop.f32.mrf.mxu1 }
 0x2df   :  { %v620_v36 = vadd.f32 %v619_v34, %v129_v46 }
 0x2e0   :  { %v2848_v37 = vpop.f32.mrf.mxu1  ;;  %v2853_v38 = vpop.f32.mrf.mxu0 }
 0x2e1   :  { %v646_v39 = vsel %vm235_vm2, %v620_v36, -inf }
 0x2e2   :  { %v622_v40 = vpop.f32.mrf.mxu0  ;;  %647 = vmax.xlane.f32.xlu0 %v646_v39 }
 0x2e4   :  { %v2854_v41 = vpop.f32.mrf.mxu0 }
 0x2ea   :  { %v627_v42 = vpop.xlane.xlu0 %626 }
 0x2eb   :  { %v649_v43 = vsub.f32 %v277_v48, %v627_v42 }
 0x2ed   :  { %v657_v44 = vmul.f32 1.442695, %v649_v43 }
 0x2ef   :  { %818 = vrot.lane.b32.xlu1 %v3509_v20, %s3345_s30  ;;  %3117 = vpow2.f32 %v657_v44 }
 0x2f3   :  { %866 = vrot.lane.b32.xlu1 %v3507_v19, %s3345_s30 }
 0x2f8   :  { %770 = vrot.lane.b32.xlu0 %v3503_v16, %s3345_s30 }
 0x2fc   :  { %v3604_v45 = vpop.eup %3117 }
 0x2fd   :  { %v673_v46 = vsel %vm235_vm2, %v3604_v45, 0.0 }
 0x317   :  { %674 = vadd.xlane.f32.xlu1 %v673_v46 }
 0x353   :  { %v630_v47 = vpop.xlane.xlu1 %629 }
 0x354   :  { %v650_v49 = vsub.f32 %v326_v54, %v630_v47 }
 0x356   :  { %v659_v50 = vmul.f32 1.442695, %v650_v49 }
 0x357   :  { %v633_v20 = vpop.xlane.xlu0 %632 }
 0x358   :  { %3119 = vpow2.f32 %v659_v50  ;;  %v651_v51 = vsub.f32 %v375_v59, %v633_v20 }
 0x35a   :  { %v661_v19 = vmul.f32 1.442695, %v651_v51 }
 0x35b   :  { %v636_v52 = vpop.xlane.xlu0 %635 }
 0x35c   :  { %3121 = vpow2.f32 %v661_v19  ;;  %v652_v16 = vsub.f32 %v424_v2, %v636_v52 }
 0x35e   :  { %v663_v53 = vmul.f32 1.442695, %v652_v16 }
 0x35f   :  { %v639_v63 = vpop.xlane.xlu1 %638 }
 0x360   :  { %3123 = vpow2.f32 %v663_v53  ;;  %v653_v1 = vsub.f32 %v3588_v11, %v639_v63 }
 0x362   :  { %v665_v7 = vmul.f32 1.442695, %v653_v1 }
 0x363   :  { %v642_v56 = vpop.xlane.xlu0 %641 }
 0x364   :  { %v654_v5 = vsub.f32 %v3592_v18, %v642_v56  ;;  %3125 = vpow2.f32 %v665_v7 }
 0x365   :  { %v3608_v48 = vpop.eup %3119 }
 0x366   :  { %v676_v55 = vsel %vm235_vm2, %v3608_v48, 0.0  ;;  %v667_v9 = vmul.f32 1.442695, %v654_v5 }
 0x367   :  { %677 = vadd.xlane.f32.xlu0 %v676_v55  ;;  %v645_v2 = vpop.xlane.xlu1 %644 }
 0x368   :  { %v655_v8 = vsub.f32 %v571_v30, %v645_v2  ;;  %3127 = vpow2.f32 %v667_v9 }
 0x369   :  { %v3612_v57 = vpop.eup %3121 }
 0x36a   :  { %v679_v54 = vsel %vm235_vm2, %v3612_v57, 0.0  ;;  %v669_v10 = vmul.f32 1.442695, %v655_v8 }
 0x36b   :  { %v648_v58 = vpop.xlane.xlu0 %647  ;;  %680 = vadd.xlane.f32.xlu1 %v679_v54  ;;  %v819_v14 = vpop.permute.xlu1 %818 }
 0x36c   :  { %v656_v12 = vsub.f32 %v620_v36, %v648_v58  ;;  %3129 = vpow2.f32 %v669_v10  ;;  %v824_v32 = vsel %vm726_vm3, %v819_v14, 0 }
 0x36d   :  { %v3616_v59 = vpop.eup %3123 }
 0x36e   :  { %v682_v60 = vsel %vm235_vm2, %v3616_v59, 0.0  ;;  %v671_v13 = vmul.f32 1.442695, %v656_v12 }
 0x36f   :  { %683 = vadd.xlane.f32.xlu0 %v682_v60  ;;  %v771_v61 = vpop.permute.xlu0 %770  ;;  %v867_v15 = vpop.permute.xlu1 %866 }
 0x370   :  { %v776_v62 = vsel %vm726_vm3, %v771_v61, 0  ;;  %3131 = vpow2.f32 %v671_v13  ;;  %v872_v40 = vsel %vm726_vm3, %v867_v15, 0 }
 0x371   :  { %2862 = vmatpush3.bf16.msra.mxu0 %v776_v62 }
 0x372   :  { %2873 = vmatprep.subr.bf16.mxu0 %v3351_v0 }
 0x37c   :  { %962 = vrot.lane.b32.xlu1 %v3515_v22, %s3345_s30  ;;  %v3628_v22 = vpop.eup %3125 }
 0x37d   :  { %v685_v11 = vsel %vm235_vm2, %v3628_v22, 0.0 }
 0x385   :  { %914 = vrot.lane.b32.xlu0 %v3517_v23, %s3345_s30  ;;  %v3630_v23 = vpop.eup %3127 }
 0x386   :  { %v3634_v17 = vpop.eup %3129  ;;  %v688_v21 = vsel %vm235_vm2, %v3630_v23, 0.0 }
 0x387   :  { %v691_v24 = vsel %vm235_vm2, %v3634_v17, 0.0  ;;  %v3640_v25 = vpop.eup %3131 }
 0x388   :  { %v694_v28 = vsel %vm235_vm2, %v3640_v25, 0.0 }
 0x3a0   :  { %686 = vadd.xlane.f32.xlu1 %v685_v11  ;;  %v675_v18 = vpop.xlane.xlu1 %674 }
 0x3a1   :  { %3133 = vrcp.f32 %v675_v18 }
 0x3a4   :  { %689 = vadd.xlane.f32.xlu0 %v688_v21  ;;  %692 = vadd.xlane.f32.xlu1 %v691_v24  ;;  %v3103_v24 = vld [vmem:[%s3970_s5 + $0x8] sm:$0xff]  }
 0x3a8   :  { %695 = vadd.xlane.f32.xlu0 %v694_v28 }
 0x3ae   :  { %v3134_v29 = vpop.eup %3133 }
 0x3af   :  { %v705_v30 = vmul.f32 %v3134_v29, %v3604_v45  ;;  %v3104_v29 = vld [vmem:[%s3970_s5] sm:$0xff]   ;;  %s3359_s5 = smov 24  }
 0x3b1   :  { %v713_v31 = vpack.c.bf16 %v705_v30, %v705_v30 }
 0x3b3   :  { %2858 = vmatmul.mubr.msk.bf16.vlgmr.msra.gmra.mxu1 %vm235_vm2, %v713_v31 }
 0x3b4   :  { %2868 = vmatpush3.bf16.msra.mxu1 %v824_v32  ;;  %2869 = vmatprep.mubr.msk.bf16.mxu1 %vm3352_vm0, %v3351_v0 }
 0x3b5   :  { %1058 = vrot.lane.b32.xlu1 %v3525_v27, %s3345_s30  ;;  %2879 = vmatprep.subr.bf16.mxu1 %v3351_v0 }
 0x3be   :  { %1010 = vrot.lane.b32.xlu0 %v3523_v26, %s3345_s30 }
 0x3f0   :  { %v678_v33 = vpop.xlane.xlu0 %677 }
 0x3f1   :  { %3135 = vrcp.f32 %v678_v33 }
 0x3f4   :  { %v681_v34 = vpop.xlane.xlu1 %680 }
 0x3f5   :  { %3137 = vrcp.f32 %v681_v34 }
 0x3f8   :  { %v684_v35 = vpop.xlane.xlu0 %683  ;;  %v963_v45 = vpop.permute.xlu1 %962 }
 0x3f9   :  { %3139 = vrcp.f32 %v684_v35  ;;  %v968_v47 = vsel %vm726_vm3, %v963_v45, 0 }
 0x3fc   :  { %v915_v41 = vpop.permute.xlu0 %914 }
 0x3fd   :  { %v920_v43 = vsel %vm726_vm3, %v915_v41, 0 }
 0x3fe   :  { %v3136_v36 = vpop.eup %3135 }
 0x3ff   :  { %v706_v37 = vmul.f32 %v3136_v36, %v3608_v48 }
 0x401   :  { %v714_v38 = vpack.c.bf16 %v706_v37, %v706_v37 }
 0x402   :  { %v3138_v39 = vpop.eup %3137 }
 0x403   :  { %2864 = vmatmul.mubr.msk.bf16.vlgmr.msra.gmra.mxu0 %vm235_vm2, %v714_v38  ;;  %v707_v27 = vmul.f32 %v3138_v39, %v3612_v57 }
 0x404   :  { %2874 = vmatpush3.bf16.msra.mxu0 %v872_v40  ;;  %2875 = vmatprep.mubr.msk.bf16.mxu0 %vm3352_vm0, %v3351_v0 }
 0x405   :  { %v715_v26 = vpack.c.bf16 %v707_v27, %v707_v27  ;;  %2885 = vmatprep.subr.bf16.mxu0 %v3351_v0 }
 0x406   :  { %v3140_v42 = vpop.eup %3139 }
 0x407   :  { %2870 = vmatmul.mubr.msk.bf16.vlgmr.msra.gmra.mxu1 %vm235_vm2, %v715_v26  ;;  %v708_v44 = vmul.f32 %v3140_v42, %v3616_v59 }
 0x408   :  { %2880 = vmatpush3.bf16.msra.mxu1 %v920_v43  ;;  %2881 = vmatprep.mubr.msk.bf16.mxu1 %vm3352_vm0, %v3351_v0 }
 0x409   :  { %v716_v46 = vpack.c.bf16 %v708_v44, %v708_v44  ;;  %2891 = vmatprep.subr.bf16.mxu1 %v3351_v0 }
 0x40b   :  { %2876 = vmatmul.mubr.msk.bf16.vlgmr.msra.gmra.mxu0 %vm235_vm2, %v716_v46 }
 0x40c   :  { %2886 = vmatpush3.bf16.msra.mxu0 %v968_v47  ;;  %2887 = vmatprep.mubr.msk.bf16.mxu0 %vm3352_vm0, %v3351_v0 }
 0x40d   :  { %2897 = vmatprep.subr.bf16.mxu0 %v3351_v0 }
 0x429   :  { %v687_v49 = vpop.xlane.xlu1 %686 }
 0x42a   :  { %3141 = vrcp.f32 %v687_v49 }
 0x42d   :  { %v690_v50 = vpop.xlane.xlu0 %689  ;;  %v693_v20 = vpop.xlane.xlu1 %692 }
 0x42e   :  { %3143 = vrcp.f32 %v690_v50 }
 0x42f   :  { %3145 = vrcp.f32 %v693_v20 }
 0x431   :  { %v696_v51 = vpop.xlane.xlu0 %695  ;;  %v1059_v54 = vpop.permute.xlu1 %1058 }
 0x432   :  { %3147 = vrcp.f32 %v696_v51  ;;  %v1064_v61 = vsel %vm726_vm3, %v1059_v54, 0 }
 0x435   :  { %v1011_v16 = vpop.permute.xlu0 %1010 }
 0x436   :  { %v1016_v56 = vsel %vm726_vm3, %v1011_v16, 0 }
 0x437   :  { %v3142_v19 = vpop.eup %3141 }
 0x438   :  { %v709_v52 = vmul.f32 %v3142_v19, %v3628_v22 }
 0x43a   :  { %v717_v53 = vpack.c.bf16 %v709_v52, %v709_v52 }
 0x43b   :  { %v3144_v48 = vpop.eup %3143 }
 0x43c   :  { %v3146_v55 = vpop.eup %3145  ;;  %2882 = vmatmul.mubr.msk.bf16.vlgmr.msra.gmra.mxu1 %vm235_vm2, %v717_v53  ;;  %v710_v57 = vmul.f32 %v3144_v48, %v3630_v23 }
 0x43d   :  { %2892 = vmatpush3.bf16.msra.mxu1 %v1016_v56  ;;  %2893 = vmatprep.mubr.msk.bf16.mxu1 %vm3352_vm0, %v3351_v0  ;;  %v711_v59 = vmul.f32 %v3146_v55, %v3634_v17 }
 0x43e   :  { %v718_v58 = vpack.c.bf16 %v710_v57, %v710_v57  ;;  %2903 = vmatprep.subr.bf16.mxu1 %v3351_v0 }
 0x43f   :  { %v3148_v60 = vpop.eup %3147  ;;  %v719_v62 = vpack.c.bf16 %v711_v59, %v711_v59 }
 0x440   :  { %2888 = vmatmul.mubr.msk.bf16.vlgmr.msra.gmra.mxu0 %vm235_vm2, %v718_v58  ;;  %v712_v63 = vmul.f32 %v3148_v60, %v3640_v25 }
 0x441   :  { %2898 = vmatpush3.bf16.msra.mxu0 %v1064_v61  ;;  %2899 = vmatprep.mubr.msk.bf16.mxu0 %vm3352_vm0, %v3351_v0 }
 0x442   :  { %2911 = vmatprep.subr.bf16.mxu0 %v3351_v0  ;;  %v720_v1 = vpack.c.bf16 %v712_v63, %v712_v63 }
 0x444   :  { %2894 = vmatmul.mubr.msk.bf16.vlgmr.msra.gmra.mxu1 %vm235_vm2, %v719_v62 }
 0x445   :  { %2907 = vmatprep.mubr.msk.bf16.mxu1 %vm3352_vm0, %v3351_v0  ;;  %2904 = vmatpush3.bf16.msra.mxu1 %v3103_v24  ;;  %v3107_v24 = vld [vmem:[#allocation2 + $0x8] sm:$0xff]  }
 0x446   :  { %2905 = vmatprep.subr.bf16.mxu1 %v3351_v0 }
 0x448   :  { %2900 = vmatmul.mubr.msk.bf16.vlgmr.msra.gmra.mxu0 %vm235_vm2, %v720_v1 }
 0x449   :  { %2915 = vmatprep.mubr.msk.bf16.mxu0 %vm3352_vm0, %v3351_v0  ;;  %2906 = vmatpush3.bf16.msra.mxu1 %v3104_v29 }
 0x44a   :  { %2919 = vmatprep.subr.bf16.mxu1 %v3351_v0  ;;  %2912 = vmatpush3.bf16.msra.mxu0 %v3107_v24 }
 0x44b   :  { %2913 = vmatprep.subr.bf16.mxu0 %v3351_v0 }
 0x473   :  { %v764_v2 = vpop.f32.mrf.mxu1 }
 0x475   :  { %v2859_v5 = vpop.f32.mrf.mxu1 }
 0x477   :  { %v767_v7 = vpop.f32.mrf.mxu1 }
 0x479   :  { %v2860_v8 = vpop.f32.mrf.mxu1 }
 0x4c3   :  { %v812_v9 = vpop.f32.mrf.mxu0 }
 0x4c5   :  { %v2865_v10 = vpop.f32.mrf.mxu0 }
 0x4c7   :  { %v815_v12 = vpop.f32.mrf.mxu0  ;;  %v860_v13 = vpop.f32.mrf.mxu1 }
 0x4c9   :  { %v2866_v14 = vpop.f32.mrf.mxu0  ;;  %v2871_v22 = vpop.f32.mrf.mxu1 }
 0x4cb   :  { %v863_v15 = vpop.f32.mrf.mxu1  ;;  %v908_v23 = vpop.f32.mrf.mxu0 }
 0x4cd   :  { %v2872_v11 = vpop.f32.mrf.mxu1  ;;  %v2877_v17 = vpop.f32.mrf.mxu0 }
 0x4ce   :  { %v3105_v11 = vld [vmem:[#allocation5 + $0x8] sm:$0xff]   ;;  %v126_v17 = vld [vmem:[%s3966_s1] sm:$0xff] }
 0x4cf   :  { %v911_v18 = vpop.f32.mrf.mxu0 }
 0x4d0   :  { %v127_v18 = vld [vmem:[%s3966_s1 + $0x8] sm:$0xff] }
 0x4d1   :  { %v2878_v21 = vpop.f32.mrf.mxu0 }
 0x4d2   :  { %v1313_v21 = vpack.c.bf16 %v127_v18, %v126_v17 }
 0x4fc   :  { %v956_v25 = vpop.f32.mrf.mxu1 }
 0x4fe   :  { %v2883_v28 = vpop.f32.mrf.mxu1 }
 0x4ff   :  { %v3733_v28 = vld [vmem:[#allocation10 + $0x1] ss:$0 sm:$0xff] }
 0x500   :  { %v959_v30 = vpop.f32.mrf.mxu1  ;;  %v1004_v31 = vpop.f32.mrf.mxu0 }
 0x501   :  { %v3071_v32 = vpack.i.bf16 %v1004_v31, %v812_v9 }
 0x502   :  { %v2884_v33 = vpop.f32.mrf.mxu1  ;;  %v2889_v34 = vpop.f32.mrf.mxu0 }
 0x503   :  { %3072 = vrot.lane.b32.xlu0 %v3071_v32, %s3357_s6 }
 0x504   :  { %v1007_v35 = vpop.f32.mrf.mxu0  ;;  %v1052_v36 = vpop.f32.mrf.mxu1 }
 0x505   :  { %v3076_v37 = vpack.i.bf16 %v1052_v36, %v860_v13 }
 0x506   :  { %v2890_v38 = vpop.f32.mrf.mxu0  ;;  %v2895_v39 = vpop.f32.mrf.mxu1 }
 0x507   :  { %3077 = vrot.lane.b32.xlu1 %v3076_v37, %s3358_s17  ;;  %v2671_v37 = vld [vmem:[#allocation11] ss:$0 sm:$0xff] }
 0x508   :  { %v1055_v40 = vpop.f32.mrf.mxu1  ;;  %v1100_v27 = vpop.f32.mrf.mxu0 }
 0x509   :  { %v3081_v41 = vpack.i.bf16 %v1100_v27, %v908_v23  ;;  %v2672_v27 = vld [vmem:[#allocation11 + $0x1] ss:$0 sm:$0xff] }
 0x50a   :  { %v2896_v26 = vpop.f32.mrf.mxu1  ;;  %v2901_v42 = vpop.f32.mrf.mxu0 }
 0x50b   :  { %3082 = vrot.lane.b32.xlu0 %v3081_v41, %s3359_s5  ;;  %1155 = vrot.lane.b32.xlu1 %v3492_v6, %s3360_s18 }
 0x50c   :  { %v1103_v43 = vpop.f32.mrf.mxu0 }
 0x50e   :  { %v2902_v44 = vpop.f32.mrf.mxu0 }
 0x575   :  { %v3073_v45 = vpop.permute.xlu0 %3072 }
 0x576   :  { %v3075_v47 = vunpack.i.h.bf16 %v3073_v45  ;;  %v3074_v49 = vunpack.i.l.bf16 %v3073_v45 }
 0x578   :  { %v1118_v19 = vsel %vm235_vm2, %v764_v2, %v3074_v49  ;;  %v1135_v52 = vsel %vm235_vm2, %v956_v25, %v3075_v47  ;;  %v3108_v25 = vld [vmem:[#allocation2] sm:$0xff]  }
 0x579   :  { %v3078_v46 = vpop.permute.xlu1 %3077  ;;  %2914 = vmatpush3.bf16.msra.mxu0 %v3108_v25 }
 0x57a   :  { %v3080_v50 = vunpack.i.h.bf16 %v3078_v46  ;;  %v3079_v20 = vunpack.i.l.bf16 %v3078_v46  ;;  %2927 = vmatprep.subr.bf16.mxu0 %v3351_v0 }
 0x57c   :  { %v1136_v48 = vsel %vm1119_vm4, %v1135_v52, %v3080_v50  ;;  %v1120_v6 = vsel %vm1119_vm4, %v1118_v19, %v3079_v20 }
 0x57d   :  { %v3083_v51 = vpop.permute.xlu0 %3082  ;;  %v1156_v54 = vpop.permute.xlu1 %1155 }
 0x57e   :  { %v3085_v16 = vunpack.i.h.bf16 %v3083_v51  ;;  %v3084_v53 = vunpack.i.l.bf16 %v3083_v51 }
 0x580   :  { %v1122_v55 = vsel %vm1121_vm5, %v1120_v6, %v3084_v53  ;;  %v1137_v56 = vsel %vm1121_vm5, %v1136_v48, %v3085_v16 }
 0x581   :  { %v1138_v57 = vpack.c.bf16 %v1137_v56, %v1122_v55 }
 0x583   :  { %2908 = vmatmul.mubr.msk.bf16.vlgmr.msra.gmra.mxu1 %vm159_vm1, %v1138_v57 }
 0x584   :  { %2923 = vmatprep.mubr.msk.bf16.mxu1 %vm3352_vm0, %v3351_v0  ;;  %2920 = vmatpush3.bf16.msra.mxu1 %v3105_v11 }
 0x585   :  { %2921 = vmatprep.subr.bf16.mxu1 %v3351_v0 }
 0x643   :  { %v1195_v58 = vpop.f32.mrf.mxu1 }
 0x644   :  { %v1196_v59 = vadd.f32 %v1195_v58, %v1156_v54 }
 0x645   :  { %v2909_v60 = vpop.f32.mrf.mxu1 }
 0x646   :  { %v1202_v61 = vadd.f32 %v1196_v59, %v3478_v3 }
 0x647   :  { %v1198_v62 = vpop.f32.mrf.mxu1 }
 0x648   :  { %v1199_v63 = vadd.f32 %v1198_v62, %v1156_v54  ;;  %v1204_v1 = vsel %vm159_vm1, %v1202_v61, 0.0 }
 0x649   :  { %1205 = vadd.xlane.f32.xlu0 %v1204_v1  ;;  %v2910_v2 = vpop.f32.mrf.mxu1 }
 0x64a   :  { %v1203_v5 = vadd.f32 %v1199_v63, %v3483_v4  ;;  %v3106_v4 = vld [vmem:[#allocation5] sm:$0xff]  }
 0x64b   :  { %2922 = vmatpush3.bf16.msra.mxu1 %v3106_v4 }
 0x64c   :  { %v1207_v7 = vsel %vm159_vm1, %v1203_v5, 0.0  ;;  %2933 = vmatprep.subr.bf16.mxu1 %v3351_v0 }
 0x64d   :  { %1208 = vadd.xlane.f32.xlu1 %v1207_v7 }
 0x64e   :  { %2924 = vmatmul.mubr.msk.bf16.vlgmr.msra.gmra.mxu1 %vm159_vm1, %v1313_v21 }
 0x64f   :  { %2935 = vmatprep.mubr.msk.bf16.mxu1 %vm3352_vm0, %v3351_v0 }
 0x65e   :  { %1330 = vrot.lane.b32.xlu1 %v3733_v28, %s3356_s26 }
 0x6d2   :  { %v1206_v8 = vpop.xlane.xlu0 %1205 }
 0x6d3   :  { %v1211_v9 = vmul.f32 0.03125, %v1206_v8 }
 0x6d5   :  { %v1213_v10 = vsub.f32 %v1202_v61, %v1211_v9 }
 0x6d6   :  { %v1209_v12 = vpop.xlane.xlu1 %1208 }
 0x6d7   :  { %v1212_v13 = vmul.f32 0.03125, %v1209_v12  ;;  %v1215_v14 = vmul.f32 %v1213_v10, %v1213_v10 }
 0x6d9   :  { %v1214_v22 = vsub.f32 %v1203_v5, %v1212_v13  ;;  %v1217_v3 = vsel %vm159_vm1, %v1215_v14, 0.0 }
 0x6da   :  { %1218 = vadd.xlane.f32.xlu0 %v1217_v3  ;;  %v1331_v44 = vpop.permute.xlu1 %1330 }
 0x6db   :  { %v1216_v15 = vmul.f32 %v1214_v22, %v1214_v22 }
 0x6dd   :  { %v1220_v23 = vsel %vm159_vm1, %v1216_v15, 0.0 }
 0x6de   :  { %1221 = vadd.xlane.f32.xlu0 %v1220_v23 }
 0x70e   :  { %v1370_v45 = vpop.f32.mrf.mxu1 }
 0x70f   :  { %v1371_v46 = vadd.f32 %v1370_v45, %v1331_v44 }
 0x710   :  { %v2925_v47 = vpop.f32.mrf.mxu1 }
 0x711   :  { %1398 = vrot.lane.b32.xlu0 %v1371_v46, %s3354_s4  ;;  %1401 = vrot.lane.b32.xlu1 %v1371_v46, %s3355_s9  ;;  %v1425_v49 = vpack.c.bf16 %v1371_v46, %v1371_v46 }
 0x712   :  { %v1373_v50 = vpop.f32.mrf.mxu1 }
 0x713   :  { %v1445_v20 = vsel %vm235_vm2, %v1425_v49, 0  ;;  %v1374_v59 = vadd.f32 %v1373_v50, %v1331_v44 }
 0x714   :  { %v2926_v51 = vpop.f32.mrf.mxu1 }
 0x715   :  { %1404 = vrot.lane.b32.xlu0 %v1371_v46, %s3353_s0  ;;  %v3779_v8 = vpack.c.bf16 %v1374_v59, %v1374_v59 }
 0x717   :  { %v1629_v13 = vsel %vm235_vm2, %v3779_v8, 0 }
 0x763   :  { %v1219_v29 = vpop.xlane.xlu0 %1218 }
 0x764   :  { %v1223_v30 = vmul.f32 0.03125, %v1219_v29 }
 0x766   :  { %v1225_v31 = vadd.f32 1e-05, %v1223_v30 }
 0x767   :  { %v1222_v32 = vpop.xlane.xlu0 %1221 }
 0x768   :  { %3149 = vrsqrt.f32 %v1225_v31  ;;  %v1224_v33 = vmul.f32 0.03125, %v1222_v32 }
 0x76a   :  { %v1226_v34 = vadd.f32 1e-05, %v1224_v33 }
 0x76c   :  { %3151 = vrsqrt.f32 %v1226_v34 }
 0x775   :  { %v3150_v35 = vpop.eup %3149 }
 0x776   :  { %v1229_v36 = vmul.f32 %v3150_v35, %v1213_v10 }
 0x778   :  { %v1236_v40 = vmul.f32 %v2671_v37, %v1229_v36 }
 0x779   :  { %v3152_v38 = vpop.eup %3151 }
 0x77a   :  { %v1230_v39 = vmul.f32 %v3152_v38, %v1214_v22  ;;  %v3737_v26 = vadd.f32 %v2672_v27, %v1236_v40 }
 0x77c   :  { %v1237_v41 = vmul.f32 %v2671_v37, %v1230_v39  ;;  %v1433_v37 = vlaneseq  ;;  %v130_v39 = vld [vmem:[%s3968_s3] sm:$0x3] }
 0x77d   :  { %v131_v40 = vmul.f32 -1e+09, %v130_v39 }
 0x77e   :  { %v3739_v42 = vadd.f32 %v2672_v27, %v1237_v41  ;;  %v1434_v38 = vshrl.u32 %v1433_v37, 7 }
 0x780   :  { %v1245_v43 = vpack.c.bf16 %v3739_v42, %v3737_v26  ;;  %v1435_v27 = vsub.s32 0, %v1434_v38 }
 0x782   :  { %2916 = vmatmul.mubr.msk.bf16.vlgmr.msra.gmra.mxu0 %vm159_vm1, %v1245_v43  ;;  %v1436_v41 = vrot.slane %v131_v40, %v1435_v27 }
 0x783   :  { %2929 = vmatprep.mubr.msk.bf16.mxu0 %vm3352_vm0, %v3351_v0  ;;  %2928 = vmatpush3.bf16.xpose.msra.mxu0 %v1445_v20  ;;  %v1399_v19 = vpop.permute.xlu0 %1398  ;;  %v1402_v53 = vpop.permute.xlu1 %1401 }
 0x784   :  { %2939 = vmatprep.subr.bf16.mxu0 %v3351_v0  ;;  %v1426_v52 = vpack.c.bf16 %v1399_v19, %v1399_v19  ;;  %v3753_v48 = vpack.c.bf16 %v1402_v53, %v1402_v53 }
 0x786   :  { %v1491_v16 = vsel %vm235_vm2, %v1426_v52, 0  ;;  %v1537_v54 = vsel %vm235_vm2, %v3753_v48, 0 }
 0x787   :  { %2934 = vmatpush3.bf16.xpose.msra.mxu1 %v1491_v16  ;;  %v1405_v62 = vpop.permute.xlu0 %1404 }
 0x788   :  { %2945 = vmatprep.subr.bf16.mxu1 %v3351_v0  ;;  %v3774_v63 = vpack.c.bf16 %v1405_v62, %v1405_v62 }
 0x78a   :  { %v1583_v7 = vsel %vm235_vm2, %v3774_v63, 0 }
 0x842   :  { %v1306_v6 = vpop.f32.mrf.mxu0 }
 0x843   :  { %v1307_v55 = vadd.f32 %v3733_v28, %v1306_v6  ;;  %v133_v6 = vrot.slane %v131_v40, 1 }
 0x844   :  { %v2917_v56 = vpop.f32.mrf.mxu0 }
 0x845   :  { %v1417_v57 = vpack.c.bf16 %v1307_v55, %v1307_v55  ;;  %1378 = vrot.lane.b32.xlu1 %v1307_v55, %s3354_s4  ;;  %1384 = vrot.lane.b32.xlu0 %v1307_v55, %s3353_s0 }
 0x846   :  { %v1309_v58 = vpop.f32.mrf.mxu0 }
 0x847   :  { %2930 = vmatmul.mubr.msk.bf16.vlgmr.msra.gmra.mxu0 %vm235_vm2, %v1417_v57  ;;  %v1310_v61 = vadd.f32 %v3733_v28, %v1309_v58 }
 0x848   :  { %v2918_v60 = vpop.f32.mrf.mxu0  ;;  %2940 = vmatpush3.bf16.xpose.msra.mxu0 %v1537_v54  ;;  %2941 = vmatprep.mubr.msk.bf16.mxu0 %vm3352_vm0, %v3351_v0 }
 0x849   :  { %1381 = vrot.lane.b32.xlu1 %v1307_v55, %s3355_s9  ;;  %1411 = vrot.lane.b32.xlu0 %v1374_v59, %s3355_s9  ;;  %v1421_v17 = vpack.c.bf16 %v1310_v61, %v1310_v61  ;;  %v1440_v60 = vrot.slane %v133_v6, %v1435_v27 }
 0x84a   :  { %2951 = vmatprep.subr.bf16.mxu0 %v3351_v0 }
 0x84d   :  { %1414 = vrot.lane.b32.xlu0 %v1374_v59, %s3353_s0  ;;  %1408 = vrot.lane.b32.xlu1 %v1374_v59, %s3354_s4 }
 0x851   :  { %1394 = vrot.lane.b32.xlu0 %v1310_v61, %s3353_s0  ;;  %1388 = vrot.lane.b32.xlu1 %v1310_v61, %s3354_s4 }
 0x855   :  { %1906 = vrot.lane.b32.xlu0 %v1425_v49, %s3356_s26  ;;  %1391 = vrot.lane.b32.xlu1 %v1310_v61, %s3355_s9 }
 0x859   :  { %1955 = vrot.lane.b32.xlu1 %v1426_v52, %s3356_s26 }
 0x8b7   :  { %v1379_v1 = vpop.permute.xlu1 %1378  ;;  %v1385_v2 = vpop.permute.xlu0 %1384 }
 0x8b8   :  { %v1418_v5 = vpack.c.bf16 %v1379_v1, %v1379_v1  ;;  %v1420_v3 = vpack.c.bf16 %v1385_v2, %v1385_v2 }
 0x8ba   :  { %2936 = vmatmul.mubr.msk.bf16.vlgmr.msra.gmra.mxu1 %vm235_vm2, %v1418_v5 }
 0x8bb   :  { %2946 = vmatpush3.bf16.xpose.msra.mxu1 %v1583_v7  ;;  %v1382_v9 = vpop.permute.xlu1 %1381  ;;  %v1412_v10 = vpop.permute.xlu0 %1411  ;;  %2947 = vmatprep.mubr.msk.bf16.mxu1 %vm3352_vm0, %v3351_v0 }
 0x8bc   :  { %v1419_v12 = vpack.c.bf16 %v1382_v9, %v1382_v9  ;;  %2957 = vmatprep.subr.bf16.mxu1 %v3351_v0  ;;  %v3792_v23 = vpack.c.bf16 %v1412_v10, %v1412_v10 }
 0x8be   :  { %2942 = vmatmul.mubr.msk.bf16.vlgmr.msra.gmra.mxu0 %vm235_vm2, %v1419_v12  ;;  %v1721_v21 = vsel %vm235_vm2, %v3792_v23, 0 }
 0x8bf   :  { %2952 = vmatpush3.bf16.xpose.msra.mxu0 %v1629_v13  ;;  %v1415_v14 = vpop.permute.xlu0 %1414  ;;  %v1409_v22 = vpop.permute.xlu1 %1408  ;;  %2953 = vmatprep.mubr.msk.bf16.mxu0 %vm3352_vm0, %v3351_v0 }
 0x8c0   :  { %v3789_v15 = vpack.c.bf16 %v1409_v22, %v1409_v22  ;;  %2963 = vmatprep.subr.bf16.mxu0 %v3351_v0  ;;  %v3802_v24 = vpack.c.bf16 %v1415_v14, %v1415_v14 }
 0x8c2   :  { %v1675_v11 = vsel %vm235_vm2, %v3789_v15, 0  ;;  %2948 = vmatmul.mubr.msk.bf16.vlgmr.msra.gmra.mxu1 %vm235_vm2, %v1420_v3  ;;  %v1767_v30 = vsel %vm235_vm2, %v3802_v24, 0 }
 0x8c3   :  { %2958 = vmatpush3.bf16.xpose.msra.mxu1 %v1675_v11  ;;  %v1389_v4 = vpop.permute.xlu1 %1388  ;;  %2959 = vmatprep.mubr.msk.bf16.mxu1 %vm3352_vm0, %v3351_v0  ;;  %v1395_v18 = vpop.permute.xlu0 %1394 }
 0x8c4   :  { %2969 = vmatprep.subr.bf16.mxu1 %v3351_v0  ;;  %v1422_v25 = vpack.c.bf16 %v1389_v4, %v1389_v4  ;;  %v1424_v35 = vpack.c.bf16 %v1395_v18, %v1395_v18 }
 0x8c6   :  { %2954 = vmatmul.mubr.msk.bf16.vlgmr.msra.gmra.mxu0 %vm235_vm2, %v1421_v17 }
 0x8c7   :  { %2964 = vmatpush3.bf16.xpose.msra.mxu0 %v1721_v21  ;;  %2965 = vmatprep.mubr.msk.bf16.mxu0 %vm3352_vm0, %v3351_v0  ;;  %v1392_v29 = vpop.permute.xlu1 %1391  ;;  %v1907_v31 = vpop.permute.xlu0 %1906 }
 0x8c8   :  { %2975 = vmatprep.subr.bf16.mxu0 %v3351_v0  ;;  %v1423_v32 = vpack.c.bf16 %v1392_v29, %v1392_v29  ;;  %v1912_v34 = vsel %vm726_vm3, %v1907_v31, 0 }
 0x8ca   :  { %2960 = vmatmul.mubr.msk.bf16.vlgmr.msra.gmra.mxu1 %vm235_vm2, %v1422_v25 }
 0x8cb   :  { %2970 = vmatpush3.bf16.xpose.msra.mxu1 %v1767_v30  ;;  %2971 = vmatprep.mubr.msk.bf16.mxu1 %vm3352_vm0, %v3351_v0  ;;  %v1956_v33 = vpop.permute.xlu1 %1955 }
 0x8cc   :  { %2981 = vmatprep.subr.bf16.mxu1 %v3351_v0  ;;  %v1961_v36 = vsel %vm726_vm3, %v1956_v33, 0 }
 0x8ce   :  { %2966 = vmatmul.mubr.msk.bf16.vlgmr.msra.gmra.mxu0 %vm235_vm2, %v1423_v32 }
 0x8cf   :  { %2976 = vmatpush3.bf16.msra.mxu0 %v1912_v34  ;;  %2977 = vmatprep.mubr.msk.bf16.mxu0 %vm3352_vm0, %v3351_v0 }
 0x8d0   :  { %2987 = vmatprep.subr.bf16.mxu0 %v3351_v0 }
 0x8d2   :  { %2972 = vmatmul.mubr.msk.bf16.vlgmr.msra.gmra.mxu1 %vm235_vm2, %v1424_v35 }
 0x8d3   :  { %2982 = vmatpush3.bf16.msra.mxu1 %v1961_v36  ;;  %2983 = vmatprep.mubr.msk.bf16.mxu1 %vm3352_vm0, %v3351_v0 }
 0x8d4   :  { %2993 = vmatprep.subr.bf16.mxu1 %v3351_v0 }
 0x907   :  { %v1481_v43 = vpop.f32.mrf.mxu0 }
 0x908   :  { %v1482_v44 = vadd.f32 %v1481_v43, %v1436_v41 }
 0x909   :  { %v2931_v45 = vpop.f32.mrf.mxu0 }
 0x90a   :  { %v1809_v46 = vsel %vm235_vm2, %v1482_v44, -inf }
 0x90b   :  { %v1484_v47 = vpop.f32.mrf.mxu0  ;;  %1810 = vmax.xlane.f32.xlu1 %v1809_v46 }
 0x90d   :  { %v2932_v49 = vpop.f32.mrf.mxu0 }
 0x97a   :  { %v1527_v50 = vpop.f32.mrf.mxu1 }
 0x97b   :  { %v1528_v20 = vadd.f32 %v1527_v50, %v1436_v41 }
 0x97c   :  { %v2937_v51 = vpop.f32.mrf.mxu1 }
 0x97d   :  { %v1812_v19 = vsel %vm235_vm2, %v1528_v20, -inf }
 0x97e   :  { %v1573_v52 = vpop.f32.mrf.mxu0  ;;  %1813 = vmax.xlane.f32.xlu0 %v1812_v19  ;;  %v1530_v16 = vpop.f32.mrf.mxu1 }
 0x97f   :  { %v1574_v53 = vadd.f32 %v1573_v52, %v1436_v41 }
 0x980   :  { %v2938_v55 = vpop.f32.mrf.mxu1  ;;  %v2943_v56 = vpop.f32.mrf.mxu0 }
 0x981   :  { %v1815_v57 = vsel %vm235_vm2, %v1574_v53, -inf }
 0x982   :  { %v1576_v54 = vpop.f32.mrf.mxu0  ;;  %1816 = vmax.xlane.f32.xlu0 %v1815_v57  ;;  %v1619_v58 = vpop.f32.mrf.mxu1 }
 0x983   :  { %v3830_v59 = vadd.f32 %v1619_v58, %v1436_v41 }
 0x984   :  { %v2944_v61 = vpop.f32.mrf.mxu0  ;;  %v2949_v62 = vpop.f32.mrf.mxu1 }
 0x985   :  { %v1818_v1 = vsel %vm235_vm2, %v3830_v59, -inf }
 0x986   :  { %v1665_v2 = vpop.f32.mrf.mxu0  ;;  %1819 = vmax.xlane.f32.xlu1 %v1818_v1  ;;  %v1622_v5 = vpop.f32.mrf.mxu1 }
 0x987   :  { %v1666_v7 = vadd.f32 %v1665_v2, %v1440_v60 }
 0x988   :  { %v2950_v9 = vpop.f32.mrf.mxu1  ;;  %v2955_v10 = vpop.f32.mrf.mxu0 }
 0x989   :  { %v1821_v12 = vsel %vm235_vm2, %v1666_v7, -inf }
 0x98a   :  { %v1668_v13 = vpop.f32.mrf.mxu0  ;;  %1822 = vmax.xlane.f32.xlu0 %v1821_v12  ;;  %v1711_v14 = vpop.f32.mrf.mxu1 }
 0x98b   :  { %v1712_v22 = vadd.f32 %v1711_v14, %v1440_v60 }
 0x98c   :  { %v2956_v3 = vpop.f32.mrf.mxu0  ;;  %v2961_v11 = vpop.f32.mrf.mxu1 }
 0x98d   :  { %v1824_v4 = vsel %vm235_vm2, %v1712_v22, -inf }
 0x98e   :  { %v1757_v17 = vpop.f32.mrf.mxu0  ;;  %1825 = vmax.xlane.f32.xlu1 %v1824_v4  ;;  %v1714_v18 = vpop.f32.mrf.mxu1 }
 0x98f   :  { %v1758_v21 = vadd.f32 %v1757_v17, %v1440_v60 }
 0x990   :  { %v2962_v25 = vpop.f32.mrf.mxu1  ;;  %v2967_v29 = vpop.f32.mrf.mxu0 }
 0x991   :  { %v1827_v30 = vsel %vm235_vm2, %v1758_v21, -inf }
 0x992   :  { %v1760_v31 = vpop.f32.mrf.mxu0  ;;  %1828 = vmax.xlane.f32.xlu0 %v1827_v30  ;;  %v1803_v32 = vpop.f32.mrf.mxu1 }
 0x993   :  { %v1804_v33 = vadd.f32 %v1803_v32, %v1440_v60 }
 0x994   :  { %v2968_v34 = vpop.f32.mrf.mxu0  ;;  %v2973_v35 = vpop.f32.mrf.mxu1 }
 0x995   :  { %v1830_v36 = vsel %vm235_vm2, %v1804_v33, -inf  ;;  %v1811_v39 = vpop.xlane.xlu1 %1810 }
 0x996   :  { %1831 = vmax.xlane.f32.xlu1 %v1830_v36  ;;  %v1806_v37 = vpop.f32.mrf.mxu1  ;;  %v1833_v40 = vsub.f32 %v1482_v44, %v1811_v39 }
 0x998   :  { %v2974_v38 = vpop.f32.mrf.mxu1  ;;  %v1841_v27 = vmul.f32 1.442695, %v1833_v40 }
 0x99a   :  { %3153 = vpow2.f32 %v1841_v27 }
 0x9a7   :  { %2004 = vrot.lane.b32.xlu1 %v3753_v48, %s3356_s26  ;;  %v3154_v41 = vpop.eup %3153 }
 0x9a8   :  { %2053 = vrot.lane.b32.xlu0 %v3774_v63, %s3356_s26  ;;  %v1857_v43 = vsel %vm235_vm2, %v3154_v41, 0.0 }
 0x9c7   :  { %1858 = vadd.xlane.f32.xlu0 %v1857_v43 }
 0xa07   :  { %v1814_v45 = vpop.xlane.xlu0 %1813 }
 0xa08   :  { %v1834_v46 = vsub.f32 %v1528_v20, %v1814_v45 }
 0xa0a   :  { %v1843_v47 = vmul.f32 1.442695, %v1834_v46 }
 0xa0b   :  { %v1817_v49 = vpop.xlane.xlu0 %1816 }
 0xa0c   :  { %3155 = vpow2.f32 %v1843_v47  ;;  %v1835_v50 = vsub.f32 %v1574_v53, %v1817_v49 }
 0xa0e   :  { %v1845_v51 = vmul.f32 1.442695, %v1835_v50 }
 0xa0f   :  { %v1820_v20 = vpop.xlane.xlu1 %1819 }
 0xa10   :  { %3157 = vpow2.f32 %v1845_v51  ;;  %v1836_v52 = vsub.f32 %v3830_v59, %v1820_v20 }
 0xa12   :  { %v1847_v55 = vmul.f32 1.442695, %v1836_v52 }
 0xa13   :  { %v1823_v16 = vpop.xlane.xlu0 %1822 }
 0xa14   :  { %v1837_v6 = vsub.f32 %v1666_v7, %v1823_v16  ;;  %3159 = vpow2.f32 %v1847_v55 }
 0xa16   :  { %v1849_v58 = vmul.f32 1.442695, %v1837_v6 }
 0xa17   :  { %v1826_v53 = vpop.xlane.xlu1 %1825 }
 0xa18   :  { %v1838_v56 = vsub.f32 %v1712_v22, %v1826_v53  ;;  %3161 = vpow2.f32 %v1849_v58 }
 0xa19   :  { %v3156_v48 = vpop.eup %3155 }
 0xa1a   :  { %v1860_v19 = vsel %vm235_vm2, %v3156_v48, 0.0  ;;  %v1851_v61 = vmul.f32 1.442695, %v1838_v56 }
 0xa1b   :  { %1861 = vadd.xlane.f32.xlu1 %v1860_v19  ;;  %v1829_v57 = vpop.xlane.xlu0 %1828 }
 0xa1c   :  { %v1839_v60 = vsub.f32 %v1758_v21, %v1829_v57  ;;  %3163 = vpow2.f32 %v1851_v61 }
 0xa1d   :  { %v3844_v63 = vpop.eup %3157 }
 0xa1e   :  { %v1863_v44 = vsel %vm235_vm2, %v3844_v63, 0.0 }
 0xa1f   :  { %1864 = vadd.xlane.f32.xlu0 %v1863_v44  ;;  %v1832_v54 = vpop.xlane.xlu1 %1831  ;;  %v2054_v59 = vpop.permute.xlu0 %2053 }
 0xa20   :  { %v1840_v62 = vsub.f32 %v1804_v33, %v1832_v54  ;;  %v2059_v34 = vsel %vm726_vm3, %v2054_v59, 0 }
 0xa22   :  { %v1855_v1 = vmul.f32 1.442695, %v1840_v62 }
 0xa23   :  { %v2005_v17 = vpop.permute.xlu1 %2004 }
 0xa24   :  { %v2010_v21 = vsel %vm726_vm3, %v2005_v17, 0 }
 0xa2c   :  { %2102 = vrot.lane.b32.xlu1 %v3779_v8, %s3356_s26  ;;  %v1853_v8 = vmul.f32 1.442695, %v1839_v60 }
 0xa2e   :  { %3165 = vpow2.f32 %v1853_v8 }
 0xa2f   :  { %3167 = vpow2.f32 %v1855_v1 }
 0xa35   :  { %2151 = vrot.lane.b32.xlu0 %v3789_v15, %s3356_s26  ;;  %v3160_v15 = vpop.eup %3159 }
 0xa36   :  { %v3853_v2 = vpop.eup %3161  ;;  %v1866_v5 = vsel %vm235_vm2, %v3160_v15, 0.0 }
 0xa37   :  { %v3856_v7 = vpop.eup %3163  ;;  %v1869_v12 = vsel %vm235_vm2, %v3853_v2, 0.0 }
 0xa38   :  { %v1872_v13 = vsel %vm235_vm2, %v3856_v7, 0.0 }
 0xa3b   :  { %v3858_v10 = vpop.eup %3165 }
 0xa3c   :  { %v3864_v14 = vpop.eup %3167  ;;  %v1875_v22 = vsel %vm235_vm2, %v3858_v10, 0.0 }
 0xa3d   :  { %v1878_v3 = vsel %vm235_vm2, %v3864_v14, 0.0 }
 0xa50   :  { %v1859_v9 = vpop.xlane.xlu0 %1858  ;;  %1867 = vadd.xlane.f32.xlu1 %v1866_v5 }
 0xa51   :  { %3169 = vrcp.f32 %v1859_v9 }
 0xa54   :  { %1870 = vadd.xlane.f32.xlu0 %v1869_v12  ;;  %1873 = vadd.xlane.f32.xlu1 %v1872_v13  ;;  %v3109_v13 = vld [vmem:[#allocation7 + $0x8] sm:$0xff]  }
 0xa58   :  { %1876 = vadd.xlane.f32.xlu0 %v1875_v22  ;;  %1879 = vadd.xlane.f32.xlu1 %v1878_v3 }
 0xa5e   :  { %v3170_v11 = vpop.eup %3169 }
 0xa5f   :  { %v1889_v4 = vmul.f32 %v3170_v11, %v3154_v41 }
 0xa61   :  { %v1897_v18 = vpack.c.bf16 %v1889_v4, %v1889_v4  ;;  %v3110_v4 = vld [vmem:[#allocation7] sm:$0xff]  }
 0xa63   :  { %2978 = vmatmul.mubr.msk.bf16.vlgmr.msra.gmra.mxu0 %vm235_vm2, %v1897_v18 }
 0xa64   :  { %2988 = vmatpush3.bf16.msra.mxu0 %v2010_v21  ;;  %2989 = vmatprep.mubr.msk.bf16.mxu0 %vm3352_vm0, %v3351_v0 }
 0xa65   :  { %2999 = vmatprep.subr.bf16.mxu0 %v3351_v0 }
 0xa69   :  { %2200 = vrot.lane.b32.xlu1 %v3792_v23, %s3356_s26 }
 0xa6e   :  { %2249 = vrot.lane.b32.xlu0 %v3802_v24, %s3356_s26 }
 0xaa4   :  { %v1862_v25 = vpop.xlane.xlu1 %1861 }
 0xaa5   :  { %3171 = vrcp.f32 %v1862_v25 }
 0xaa8   :  { %v1865_v29 = vpop.xlane.xlu0 %1864  ;;  %v2103_v36 = vpop.permute.xlu1 %2102 }
 0xaa9   :  { %3173 = vrcp.f32 %v1865_v29  ;;  %v2108_v24 = vsel %vm726_vm3, %v2103_v36, 0 }
 0xaac   :  { %v2152_v37 = vpop.permute.xlu0 %2151 }
 0xaad   :  { %v2157_v50 = vsel %vm726_vm3, %v2152_v37, 0 }
 0xab2   :  { %v3172_v30 = vpop.eup %3171 }
 0xab3   :  { %v1890_v31 = vmul.f32 %v3172_v30, %v3156_v48 }
 0xab5   :  { %v1898_v32 = vpack.c.bf16 %v1890_v31, %v1890_v31 }
 0xab6   :  { %v3174_v33 = vpop.eup %3173 }
 0xab7   :  { %2984 = vmatmul.mubr.msk.bf16.vlgmr.msra.gmra.mxu1 %vm235_vm2, %v1898_v32  ;;  %v1891_v35 = vmul.f32 %v3174_v33, %v3844_v63 }
 0xab8   :  { %2994 = vmatpush3.bf16.msra.mxu1 %v2059_v34  ;;  %2995 = vmatprep.mubr.msk.bf16.mxu1 %vm3352_vm0, %v3351_v0 }
 0xab9   :  { %v1899_v23 = vpack.c.bf16 %v1891_v35, %v1891_v35  ;;  %3005 = vmatprep.subr.bf16.mxu1 %v3351_v0 }
 0xabb   :  { %2990 = vmatmul.mubr.msk.bf16.vlgmr.msra.gmra.mxu0 %vm235_vm2, %v1899_v23 }
 0xabc   :  { %3000 = vmatpush3.bf16.msra.mxu0 %v2108_v24  ;;  %3001 = vmatprep.mubr.msk.bf16.mxu0 %vm3352_vm0, %v3351_v0 }
 0xabd   :  { %3011 = vmatprep.subr.bf16.mxu0 %v3351_v0 }
 0xad9   :  { %v1868_v38 = vpop.xlane.xlu1 %1867 }
 0xada   :  { %3175 = vrcp.f32 %v1868_v38 }
 0xadd   :  { %v1871_v39 = vpop.xlane.xlu0 %1870  ;;  %v1874_v40 = vpop.xlane.xlu1 %1873 }
 0xade   :  { %3177 = vrcp.f32 %v1871_v39 }
 0xadf   :  { %3179 = vrcp.f32 %v1874_v40 }
 0xae1   :  { %v1877_v27 = vpop.xlane.xlu0 %1876  ;;  %v1880_v41 = vpop.xlane.xlu1 %1879 }
 0xae2   :  { %3181 = vrcp.f32 %v1877_v27 }
 0xae3   :  { %3183 = vrcp.f32 %v1880_v41 }
 0xae5   :  { %v2201_v48 = vpop.permute.xlu1 %2200  ;;  %v2250_v52 = vpop.permute.xlu0 %2249 }
 0xae6   :  { %v2206_v20 = vsel %vm726_vm3, %v2201_v48, 0  ;;  %v2255_v55 = vsel %vm726_vm3, %v2250_v52, 0 }
 0xae7   :  { %v3176_v43 = vpop.eup %3175 }
 0xae8   :  { %v1892_v45 = vmul.f32 %v3176_v43, %v3160_v15 }
 0xaea   :  { %v1900_v46 = vpack.c.bf16 %v1892_v45, %v1892_v45 }
 0xaeb   :  { %v3178_v47 = vpop.eup %3177 }
 0xaec   :  { %v3180_v49 = vpop.eup %3179  ;;  %2996 = vmatmul.mubr.msk.bf16.vlgmr.msra.gmra.mxu1 %vm235_vm2, %v1900_v46  ;;  %v1893_v51 = vmul.f32 %v3178_v47, %v3853_v2 }
 0xaed   :  { %3006 = vmatpush3.bf16.msra.mxu1 %v2157_v50  ;;  %3007 = vmatprep.mubr.msk.bf16.mxu1 %vm3352_vm0, %v3351_v0  ;;  %v1894_v63 = vmul.f32 %v3180_v49, %v3856_v7 }
 0xaee   :  { %v1901_v19 = vpack.c.bf16 %v1893_v51, %v1893_v51  ;;  %3017 = vmatprep.subr.bf16.mxu1 %v3351_v0 }
 0xaef   :  { %v3182_v44 = vpop.eup %3181  ;;  %v1902_v16 = vpack.c.bf16 %v1894_v63, %v1894_v63 }
 0xaf0   :  { %3002 = vmatmul.mubr.msk.bf16.vlgmr.msra.gmra.mxu0 %vm235_vm2, %v1901_v19  ;;  %v1895_v53 = vmul.f32 %v3182_v44, %v3858_v10  ;;  %v3184_v6 = vpop.eup %3183 }
 0xaf1   :  { %3012 = vmatpush3.bf16.msra.mxu0 %v2206_v20  ;;  %3013 = vmatprep.mubr.msk.bf16.mxu0 %vm3352_vm0, %v3351_v0  ;;  %v1896_v57 = vmul.f32 %v3184_v6, %v3864_v14 }
 0xaf2   :  { %3023 = vmatprep.subr.bf16.mxu0 %v3351_v0  ;;  %v1903_v56 = vpack.c.bf16 %v1895_v53, %v1895_v53 }
 0xaf3   :  { %v1904_v54 = vpack.c.bf16 %v1896_v57, %v1896_v57 }
 0xaf4   :  { %3008 = vmatmul.mubr.msk.bf16.vlgmr.msra.gmra.mxu1 %vm235_vm2, %v1902_v16 }
 0xaf5   :  { %3018 = vmatpush3.bf16.msra.mxu1 %v2255_v55  ;;  %3019 = vmatprep.mubr.msk.bf16.mxu1 %vm3352_vm0, %v3351_v0 }
 0xaf6   :  { %3031 = vmatprep.subr.bf16.mxu1 %v3351_v0 }
 0xaf8   :  { %3014 = vmatmul.mubr.msk.bf16.vlgmr.msra.gmra.mxu0 %vm235_vm2, %v1903_v56 }
 0xaf9   :  { %3027 = vmatprep.mubr.msk.bf16.mxu0 %vm3352_vm0, %v3351_v0  ;;  %3024 = vmatpush3.bf16.msra.mxu0 %v3109_v13  ;;  %v2701_v13 = vld [vmem:[#allocation10 + $0x2] ss:$0 sm:$0xff] }
 0xafa   :  { %3025 = vmatprep.subr.bf16.mxu0 %v3351_v0 }
 0xafc   :  { %3020 = vmatmul.mubr.msk.bf16.vlgmr.msra.gmra.mxu1 %vm235_vm2, %v1904_v54 }
 0xafd   :  { %3035 = vmatprep.mubr.msk.bf16.mxu1 %vm3352_vm0, %v3351_v0  ;;  %3026 = vmatpush3.bf16.msra.mxu0 %v3110_v4 }
 0xafe   :  { %3039 = vmatprep.subr.bf16.mxu0 %v3351_v0 }
 0xb23   :  { %v1948_v58 = vpop.f32.mrf.mxu0 }
 0xb25   :  { %v2979_v60 = vpop.f32.mrf.mxu0 }
 0xb27   :  { %v1951_v61 = vpop.f32.mrf.mxu0 }
 0xb29   :  { %v2980_v62 = vpop.f32.mrf.mxu0 }
 0xb77   :  { %v1997_v8 = vpop.f32.mrf.mxu1 }
 0xb79   :  { %v2985_v1 = vpop.f32.mrf.mxu1 }
 0xb7b   :  { %v2000_v15 = vpop.f32.mrf.mxu1  ;;  %v2046_v59 = vpop.f32.mrf.mxu0 }
 0xb7d   :  { %v2986_v2 = vpop.f32.mrf.mxu1  ;;  %v2991_v5 = vpop.f32.mrf.mxu0 }
 0xb7f   :  { %v2049_v7 = vpop.f32.mrf.mxu0 }
 0xb81   :  { %v2992_v9 = vpop.f32.mrf.mxu0 }
 0xbac   :  { %v2095_v10 = vpop.f32.mrf.mxu1 }
 0xbae   :  { %v2997_v12 = vpop.f32.mrf.mxu1 }
 0xbaf   :  { %v3113_v12 = vld [vmem:[%s3975_s10 + $0x18] sm:$0xff]  }
 0xbb0   :  { %v2098_v14 = vpop.f32.mrf.mxu1  ;;  %v2144_v22 = vpop.f32.mrf.mxu0 }
 0xbb2   :  { %v2998_v3 = vpop.f32.mrf.mxu1  ;;  %v3003_v11 = vpop.f32.mrf.mxu0 }
 0xbb4   :  { %v2147_v17 = vpop.f32.mrf.mxu0  ;;  %v2193_v18 = vpop.f32.mrf.mxu1 }
 0xbb5   :  { %v3086_v21 = vpack.i.bf16 %v2193_v18, %v1997_v8 }
 0xbb6   :  { %v3004_v25 = vpop.f32.mrf.mxu0  ;;  %v3009_v29 = vpop.f32.mrf.mxu1 }
 0xbb7   :  { %3087 = vrot.lane.b32.xlu1 %v3086_v21, %s3357_s6  ;;  %v2699_v25 = vld [vmem:[#allocation11 + $0x2] ss:$0 sm:$0xff] }
 0xbb8   :  { %v2196_v30 = vpop.f32.mrf.mxu1  ;;  %v2242_v31 = vpop.f32.mrf.mxu0 }
 0xbb9   :  { %v3091_v32 = vpack.i.bf16 %v2242_v31, %v2046_v59 }
 0xbba   :  { %v3010_v33 = vpop.f32.mrf.mxu1  ;;  %v3015_v34 = vpop.f32.mrf.mxu0 }
 0xbbb   :  { %3092 = vrot.lane.b32.xlu0 %v3091_v32, %s3358_s17  ;;  %v2700_v32 = vld [vmem:[#allocation11 + $0x3] ss:$0 sm:$0xff] }
 0xbbc   :  { %v2245_v35 = vpop.f32.mrf.mxu0  ;;  %v2291_v36 = vpop.f32.mrf.mxu1 }
 0xbbd   :  { %v3096_v23 = vpack.i.bf16 %v2291_v36, %v2095_v10  ;;  %v3111_v10 = vld [vmem:[#allocation8 + $0x8] sm:$0xff]  }
 0xbbe   :  { %v3016_v24 = vpop.f32.mrf.mxu0  ;;  %v3021_v37 = vpop.f32.mrf.mxu1  ;;  %3032 = vmatpush3.bf16.msra.mxu1 %v3111_v10 }
 0xbbf   :  { %3097 = vrot.lane.b32.xlu1 %v3096_v23, %s3359_s5  ;;  %2344 = vrot.lane.b32.xlu0 %v3733_v28, %s3360_s18  ;;  %v3114_v23 = vld [vmem:[%s3975_s10 + $0x10] sm:$0xff]   ;;  %v3115_v24 = vld [vmem:[%s3975_s10 + $0x8] sm:$0xff]  }
 0xbc0   :  { %v2294_v38 = vpop.f32.mrf.mxu1  ;;  %3033 = vmatprep.subr.bf16.mxu1 %v3351_v0  ;;  %v3116_v37 = vld [vmem:[%s3975_s10] sm:$0xff]   ;;  %s3361_s10 = smov [#allocation13]  }
 0xbc1   :  { %s2633_s25 = sshll.u32 %s3361_s10, 4  ;;  %s2634_s25 = int_to_ptr.vmem [resolvable:$true] %s2633_s25 }
 0xbc2   :  { %v3022_v39 = vpop.f32.mrf.mxu1  ;;  %s3313_s0 = scalar_lea.vmem %s2634_s25, 256  ;;  %p3318_p3 = scmp.lt.s32.totalorder %s2634_s25, %s2634_s25 }
 0xbc3   :  { %p3314_p2 = scmp.ne.s32.totalorder %s2634_s25, %s3313_s0  ;;  %p3319_p4 = scmp.lt.s32.totalorder %s3313_s0, %s3313_s0 }
 0xbc5   :  { %p3320_p5 = por %p3319_p4, %p3318_p3 }
 0xbc7   :  { %p3321_p6 = pnand %p3320_p5, %p3314_p2 }
 0xc29   :  { %v3088_v40 = vpop.permute.xlu1 %3087 }
 0xc2a   :  { %v3090_v41 = vunpack.i.h.bf16 %v3088_v40  ;;  %v3089_v43 = vunpack.i.l.bf16 %v3088_v40 }
 0xc2c   :  { %v2324_v49 = vsel %vm235_vm2, %v2144_v22, %v3090_v41  ;;  %v2309_v50 = vsel %vm235_vm2, %v1948_v58, %v3089_v43 }
 0xc2d   :  { %v3093_v27 = vpop.permute.xlu0 %3092 }
 0xc2e   :  { %v3095_v45 = vunpack.i.h.bf16 %v3093_v27  ;;  %v3094_v46 = vunpack.i.l.bf16 %v3093_v27 }
 0xc30   :  { %v2310_v19 = vsel %vm1119_vm4, %v2309_v50, %v3094_v46  ;;  %v2325_v63 = vsel %vm1119_vm4, %v2324_v49, %v3095_v45 }
 0xc31   :  { %v3098_v47 = vpop.permute.xlu1 %3097  ;;  %v2345_v52 = vpop.permute.xlu0 %2344 }
 0xc32   :  { %v3100_v51 = vunpack.i.h.bf16 %v3098_v47  ;;  %v3099_v48 = vunpack.i.l.bf16 %v3098_v47 }
 0xc34   :  { %v2326_v28 = vsel %vm1121_vm5, %v2325_v63, %v3100_v51  ;;  %v2311_v44 = vsel %vm1121_vm5, %v2310_v19, %v3099_v48 }
 0xc35   :  { %v2327_v20 = vpack.c.bf16 %v2326_v28, %v2311_v44 }
 0xc37   :  { %3028 = vmatmul.mubr.msk.bf16.vlgmr.msra.gmra.mxu0 %vm159_vm1, %v2327_v20 }
 0xc38   :  { %3047 = vmatprep.mubr.msk.bf16.mxu0 %vm3352_vm0, %v3351_v0  ;;  %3040 = vmatpush3.bf16.msra.mxu0 %v3113_v12 }
 0xc39   :  { %3041 = vmatprep.subr.bf16.mxu0 %v3351_v0 }
 0xc3c   :  { %3042 = vmatpush3.bf16.msra.mxu0 %v3114_v23 }
 0xc3d   :  { %3043 = vmatprep.subr.bf16.mxu0 %v3351_v0 }
 0xc40   :  { %3044 = vmatpush3.bf16.msra.mxu0 %v3115_v24 }
 0xc41   :  { %3045 = vmatprep.subr.bf16.mxu0 %v3351_v0 }
 0xc44   :  { %3046 = vmatpush3.bf16.msra.mxu0 %v3116_v37 }
 0xcf7   :  { %v2384_v16 = vpop.f32.mrf.mxu0 }
 0xcf8   :  { %v2385_v53 = vadd.f32 %v2384_v16, %v2345_v52 }
 0xcf9   :  { %v3029_v6 = vpop.f32.mrf.mxu0 }
 0xcfa   :  { %v2391_v55 = vadd.f32 %v2385_v53, %v3737_v26 }
 0xcfb   :  { %v2387_v56 = vpop.f32.mrf.mxu0 }
 0xcfc   :  { %v2388_v57 = vadd.f32 %v2387_v56, %v2345_v52  ;;  %v2393_v54 = vsel %vm159_vm1, %v2391_v55, 0.0 }
 0xcfd   :  { %2394 = vadd.xlane.f32.xlu1 %v2393_v54  ;;  %v3030_v58 = vpop.f32.mrf.mxu0 }
 0xcfe   :  { %v2392_v60 = vadd.f32 %v2388_v57, %v3739_v42  ;;  %v3112_v42 = vld [vmem:[#allocation8] sm:$0xff]  }
 0xcff   :  { %3034 = vmatpush3.bf16.msra.mxu1 %v3112_v42 }
 0xd00   :  { %v2396_v61 = vsel %vm159_vm1, %v2392_v60, 0.0 }
 0xd01   :  { %2397 = vadd.xlane.f32.xlu0 %v2396_v61 }
 0xd86   :  { %v2395_v62 = vpop.xlane.xlu1 %2394 }
 0xd87   :  { %v2399_v8 = vmul.f32 0.03125, %v2395_v62 }
 0xd89   :  { %v2401_v1 = vsub.f32 %v2391_v55, %v2399_v8 }
 0xd8a   :  { %v2398_v15 = vpop.xlane.xlu0 %2397 }
 0xd8b   :  { %v2400_v59 = vmul.f32 0.03125, %v2398_v15  ;;  %v2403_v2 = vmul.f32 %v2401_v1, %v2401_v1 }
 0xd8d   :  { %v2402_v5 = vsub.f32 %v2392_v60, %v2400_v59  ;;  %v2405_v26 = vsel %vm159_vm1, %v2403_v2, 0.0 }
 0xd8e   :  { %2406 = vadd.xlane.f32.xlu0 %v2405_v26  ;;  %v2710_v26 = vld [vmem:[#allocation11 + $0x4] ss:$0 sm:$0xff] }
 0xd8f   :  { %v2404_v7 = vmul.f32 %v2402_v5, %v2402_v5 }
 0xd91   :  { %v2408_v9 = vsel %vm159_vm1, %v2404_v7, 0.0 }
 0xd92   :  { %2409 = vadd.xlane.f32.xlu1 %v2408_v9  ;;  %v2711_v9 = vld [vmem:[#allocation11 + $0x5] ss:$0 sm:$0xff] }
 0xda4   :  { %2536 = vrot.lane.b32.xlu0 %v2701_v13, %s3345_s30 }
 0xe17   :  { %v2407_v14 = vpop.xlane.xlu0 %2406 }
 0xe18   :  { %v2411_v22 = vmul.f32 0.03125, %v2407_v14 }
 0xe1a   :  { %v2413_v3 = vadd.f32 1e-05, %v2411_v22 }
 0xe1b   :  { %v2410_v11 = vpop.xlane.xlu1 %2409  ;;  %v2537_v49 = vpop.permute.xlu0 %2536 }
 0xe1c   :  { %3185 = vrsqrt.f32 %v2413_v3  ;;  %v2412_v4 = vmul.f32 0.03125, %v2410_v11 }
 0xe1e   :  { %v2414_v17 = vadd.f32 1e-05, %v2412_v4 }
 0xe20   :  { %3187 = vrsqrt.f32 %v2414_v17 }
 0xe29   :  { %v3186_v18 = vpop.eup %3185 }
 0xe2a   :  { %v2417_v21 = vmul.f32 %v3186_v18, %v2401_v1 }
 0xe2c   :  { %v2424_v31 = vmul.f32 %v2699_v25, %v2417_v21 }
 0xe2d   :  { %v3188_v29 = vpop.eup %3187 }
 0xe2e   :  { %v2418_v30 = vmul.f32 %v3188_v29, %v2402_v5  ;;  %v2431_v34 = vadd.f32 %v2700_v32, %v2424_v31 }
 0xe30   :  { %v2425_v33 = vmul.f32 %v2699_v25, %v2418_v30 }
 0xe32   :  { %v2432_v35 = vadd.f32 %v2700_v32, %v2425_v33 }
 0xe34   :  { %v2433_v36 = vpack.c.bf16 %v2432_v35, %v2431_v34 }
 0xe36   :  { %3036 = vmatmul.mubr.msk.bf16.vlgmr.msra.gmra.mxu1 %vm159_vm1, %v2433_v36 }
 0xef6   :  { %v2494_v38 = vpop.f32.mrf.mxu1 }
 0xef7   :  { %v2495_v40 = vadd.f32 %v2701_v13, %v2494_v38 }
 0xef8   :  { %v3037_v39 = vpop.f32.mrf.mxu1 }
 0xef9   :  { %v2501_v45 = vmax.f32 %v2495_v40, 0.0 }
 0xefa   :  { %v2497_v27 = vpop.f32.mrf.mxu1 }
 0xefb   :  { %v2498_v41 = vadd.f32 %v2701_v13, %v2497_v27 }
 0xefc   :  { %v3038_v43 = vpop.f32.mrf.mxu1 }
 0xefd   :  { %v2502_v46 = vmax.f32 %v2498_v41, 0.0 }
 0xeff   :  { %v2503_v47 = vpack.c.bf16 %v2502_v46, %v2501_v45 }
 0xf01   :  { %3048 = vmatmul.mubr.msk.bf16.vlgmr.msra.gmra.mxu0 %vm2539_vm6, %v2503_v47 }
 0xfc1   :  { %v2577_v50 = vpop.f32.mrf.mxu0 }
 0xfc2   :  { %v2578_v51 = vadd.f32 %v2577_v50, %v2537_v49 }
 0xfc3   :  { %v3049_v0 = vpop.f32.mrf.mxu0 }
 0xfc4   :  { %v2584_v48 = vadd.f32 %v2578_v51, %v2431_v34 }
 0xfc5   :  { %v2580_v19 = vpop.f32.mrf.mxu0 }
 0xfc6   :  { %v2581_v63 = vadd.f32 %v2580_v19, %v2537_v49  ;;  %v2586_v28 = vsel %vm159_vm1, %v2584_v48, 0.0 }
 0xfc7   :  { %2587 = vadd.xlane.f32.xlu1 %v2586_v28  ;;  %v3050_v44 = vpop.f32.mrf.mxu0 }
 0xfc8   :  { %v2585_v20 = vadd.f32 %v2581_v63, %v2432_v35 }
 0xfca   :  { %v2589_v52 = vsel %vm159_vm1, %v2585_v20, 0.0 }
 0xfcb   :  { %2590 = vadd.xlane.f32.xlu1 %v2589_v52 }
0x1050   :  { %v2588_v16 = vpop.xlane.xlu1 %2587 }
0x1051   :  { %v2592_v53 = vmul.f32 0.03125, %v2588_v16 }
0x1053   :  { %v2594_v6 = vsub.f32 %v2584_v48, %v2592_v53 }
0x1054   :  { %v2591_v55 = vpop.xlane.xlu1 %2590 }
0x1055   :  { %v2593_v56 = vmul.f32 0.03125, %v2591_v55  ;;  %v2596_v57 = vmul.f32 %v2594_v6, %v2594_v6 }
0x1057   :  { %v2595_v54 = vsub.f32 %v2585_v20, %v2593_v56  ;;  %v2598_v58 = vsel %vm159_vm1, %v2596_v57, 0.0 }
0x1058   :  { %2599 = vadd.xlane.f32.xlu1 %v2598_v58 }
0x1059   :  { %v2597_v60 = vmul.f32 %v2595_v54, %v2595_v54 }
0x105b   :  { %v2601_v61 = vsel %vm159_vm1, %v2597_v60, 0.0 }
0x105c   :  { %2602 = vadd.xlane.f32.xlu1 %v2601_v61 }
0x10e1   :  { %v2600_v62 = vpop.xlane.xlu1 %2599 }
0x10e2   :  { %v2604_v8 = vmul.f32 0.03125, %v2600_v62 }
0x10e4   :  { %v2606_v1 = vadd.f32 1e-05, %v2604_v8 }
0x10e5   :  { %v2603_v15 = vpop.xlane.xlu1 %2602 }
0x10e6   :  { %3189 = vrsqrt.f32 %v2606_v1  ;;  %v2605_v59 = vmul.f32 0.03125, %v2603_v15 }
0x10e8   :  { %v2607_v2 = vadd.f32 1e-05, %v2605_v59 }
0x10ea   :  { %3191 = vrsqrt.f32 %v2607_v2 }
0x10f3   :  { %v3190_v5 = vpop.eup %3189 }
0x10f4   :  { %v2610_v7 = vmul.f32 %v3190_v5, %v2594_v6 }
0x10f6   :  { %v2617_v10 = vmul.f32 %v2710_v26, %v2610_v7 }
0x10f7   :  { %v3192_v42 = vpop.eup %3191 }
0x10f8   :  { %v2611_v12 = vmul.f32 %v3192_v42, %v2595_v54  ;;  %v2624_v13 = vadd.f32 %v2711_v9, %v2617_v10 }
0x10fa   :  { %v2618_v14 = vmul.f32 %v2710_v26, %v2611_v12  ;;  %2626 = vst.msk [vmem:[#allocation13] sm:$0xff] %vm159_vm1, %v2624_v13 }
0x10fc   :  { %v2625_v22 = vadd.f32 %v2711_v9, %v2618_v14 }
0x10fe   :  { %2627 = vst.msk [vmem:[#allocation13 + $0x8] sm:$0xff] %vm159_vm1, %v2625_v22 }
0x10ff   :  { %3324 = shalt.err (!%p3321_p6)
}
0x1100   :  { %s3362_s4 = smov 128  }
0x1101   :  { %2639 = dma.vmem_to_hbm [thread:$0]  %s2634_s25, 256, %s3978_s13, [#allocation4], %s3362_s4, %s3362_s4, %s3357_s6  }
0x1102   :  { %3341 = dma.done.wait [#allocation4], 256  }
0x1103   :  { %3342 = vsyncadd [#allocation4], 4294967040 }
0x1104   :  { %2643 = vsyncpa [#allocation3], 1 }
0x1105   :  { %2644 = vsyncpa [#allocation6], 1 }
0x1106   :  { %2645 = vsyncpa [#allocation9], 1 }
0x1107   :  { %2646 = vsyncpa [#allocation12], 1 }
0x1108   :  { %2647 = vsyncpa [#allocation4], 1 }

</bundles_post_ra>
